<compile_context>
chip_gen: v6e
topology: v6e:2x2x1
jax: 0.10.0
libtpu: 0.0.40
codegen_flags: <defaults>
</compile_context>

<pallas_src>
import math

import jax
import jax.numpy as jnp
from jax.experimental import pallas as pl
from jax.experimental.pallas import tpu as pltpu

# ---- small, module-consistent shapes -------------------------------------------------
B, S, C, H, W = 2, 8, 4, 16, 16          # batch, num slices, channels, spatial
HIDDEN = 64                              # hidden_size
N_CLASSES = 2
NUM_HEADS = HIDDEN // 32                 # as in Multi_slice_Model('transformer')
HEAD_DIM = HIDDEN // NUM_HEADS
HW = H * W
OUT_PAD = 128                            # lane-dense padded logits width


# ---- Pallas kernel: whole forward for the whole batch in one step ---------------------
def multi_slice_kernel(x_ref, avg_ref, w_enc_ref, b_enc_ref,
                       w_q_ref, b_q_ref, w_k_ref, b_k_ref, w_v_ref, b_v_ref,
                       w_out_ref, b_out_ref, w_fc_ref, b_fc_ref,
                       o_ref, res_ref):
    # --- encoder: fused mean-pool + Linear + ReLU (one K = C*HW MXU matmul) ----------
    enc = jnp.maximum(
        jnp.dot(x_ref[...], w_enc_ref[...], preferred_element_type=jnp.float32)
        + b_enc_ref[...],
        0.0,
    )                                                        # (B*S, HIDDEN)

    # residual + output-projection bias accumulator (per-head contributions added below)
    res_ref[...] = enc + b_out_ref[...]

    # --- multi-head self-attention (Q = K = V = enc), batch_first semantics ----------
    for h in range(NUM_HEADS):                               # static (NUM_HEADS == 2)
        # lane-clean per-head projections (no lane-offset slicing of a 192-wide QKV)
        qh = jnp.dot(enc, w_q_ref[h], preferred_element_type=jnp.float32) + b_q_ref[h]
        kh = jnp.dot(enc, w_k_ref[h], preferred_element_type=jnp.float32) + b_k_ref[h]
        vh = jnp.dot(enc, w_v_ref[h], preferred_element_type=jnp.float32) + b_v_ref[h]
        for b in range(B):                                   # static (B == 2)
            lo, hi = b * S, (b + 1) * S                      # sublane-aligned (8)
            q_b, k_b, v_b = qh[lo:hi], kh[lo:hi], vh[lo:hi]
            # scores: 1/sqrt(head_dim) already folded into w_q/b_q host-side
            s = jax.lax.dot_general(q_b, k_b, (((1,), (1,)), ((), ())),
                                    preferred_element_type=jnp.float32)   # (S, S)
            s = s - jnp.max(s, axis=-1, keepdims=True)
            p = jnp.exp(s)
            p = p * pl.reciprocal(jnp.sum(p, axis=-1, keepdims=True), approx=True)
            a_h = jnp.dot(p, v_b, preferred_element_type=jnp.float32)     # (S, HEAD_DIM)
            # fold head-concat into the output projection: accumulate per-head slice
            res_ref[lo:hi, :] = res_ref[lo:hi, :] + jnp.dot(
                a_h, w_out_ref[h], preferred_element_type=jnp.float32)

    # --- per-batch mean over slices as a (B, B*S) @ (B*S, HIDDEN) matmul --------------
    fused = jnp.dot(avg_ref[...], res_ref[...], preferred_element_type=jnp.float32)

    # --- classification head, lane-dense (padded to 128) single aligned store --------
    o_ref[...] = (jnp.dot(fused, w_fc_ref[...], preferred_element_type=jnp.float32)
                  + b_fc_ref[...])


# ---- wrapper --------------------------------------------------------------------------
def multi_slice_forward(X, params):
    x_flat = X.reshape(B * S, C * HW).astype(jnp.float32)

    scale = 1.0 / math.sqrt(HEAD_DIM)

    # fuse the spatial mean-pool into the encoder weight (K = C*HW)
    w_enc_big = (jnp.repeat(params["w_enc"], HW, axis=0) / HW).astype(jnp.float32)

    # per-head, lane-clean Q/K/V and output-projection weights; scale folded into Q
    def per_head_w(w):      # (HIDDEN, HIDDEN) -> (NUM_HEADS, HIDDEN, HEAD_DIM)
        return w.reshape(HIDDEN, NUM_HEADS, HEAD_DIM).transpose(1, 0, 2)

    def per_head_b(b):      # (1, HIDDEN) -> (NUM_HEADS, 1, HEAD_DIM)
        return b.reshape(NUM_HEADS, HEAD_DIM)[:, None, :]

    w_q_h = per_head_w(params["w_q"] * scale)
    b_q_h = per_head_b(params["b_q"] * scale)
    w_k_h = per_head_w(params["w_k"])
    b_k_h = per_head_b(params["b_k"])
    w_v_h = per_head_w(params["w_v"])
    b_v_h = per_head_b(params["b_v"])
    w_out_h = params["w_out"].reshape(NUM_HEADS, HEAD_DIM, HIDDEN)

    # lane-dense (128-wide) classifier head; sliced back to N_CLASSES on host
    w_fc_pad = jnp.zeros((HIDDEN, OUT_PAD), jnp.float32).at[:, :N_CLASSES].set(params["w_fc"])
    b_fc_pad = jnp.zeros((1, OUT_PAD), jnp.float32).at[:, :N_CLASSES].set(params["b_fc"])

    # per-batch slice-mean as a matmul: avg_mat[b, b*S + s] = 1/S
    avg_mat = (jnp.repeat(jnp.eye(B, dtype=jnp.float32), S, axis=1) / S)   # (B, B*S)

    def _full(shape):
        n = len(shape)
        return pl.BlockSpec(shape, lambda i, _n=n: (0,) * _n)

    inputs = (x_flat, avg_mat, w_enc_big, params["b_enc"],
              w_q_h, b_q_h, w_k_h, b_k_h, w_v_h, b_v_h,
              w_out_h, params["b_out"], w_fc_pad, b_fc_pad)

    out = pl.pallas_call(
        multi_slice_kernel,
        out_shape=jax.ShapeDtypeStruct((B, OUT_PAD), jnp.float32),
        grid=(1,),                                   # whole batch in one grid step
        in_specs=[_full(a.shape) for a in inputs],
        out_specs=_full((B, OUT_PAD)),
        scratch_shapes=[pltpu.VMEM((B * S, HIDDEN), jnp.float32)],
        compiler_params=pltpu.CompilerParams(dimension_semantics=("arbitrary",)),
    )(*inputs)
    return out[:, :N_CLASSES]


# ---- deterministic parameter init ------------------------------------------------------
def init_params(key):
    ks = jax.random.split(key, 12)

    def init(k, shape, scale):
        return (scale * jax.random.normal(k, shape)).astype(jnp.float32)

    s_h = 1.0 / math.sqrt(HIDDEN)
    return dict(
        w_enc=init(ks[0], (C, HIDDEN), 1.0 / math.sqrt(C)),
        b_enc=init(ks[1], (1, HIDDEN), 0.02),
        w_q=init(ks[2], (HIDDEN, HIDDEN), s_h),
        b_q=init(ks[3], (1, HIDDEN), 0.02),
        w_k=init(ks[4], (HIDDEN, HIDDEN), s_h),
        b_k=init(ks[5], (1, HIDDEN), 0.02),
        w_v=init(ks[6], (HIDDEN, HIDDEN), s_h),
        b_v=init(ks[7], (1, HIDDEN), 0.02),
        w_out=init(ks[8], (HIDDEN, HIDDEN), s_h),
        b_out=init(ks[9], (1, HIDDEN), 0.02),
        w_fc=init(ks[10], (HIDDEN, N_CLASSES), s_h),
        b_fc=init(ks[11], (1, N_CLASSES), 0.02),
    )


# ---- pure-JAX reference (for correctness check) ----------------------------------------
def ref_forward(X, p):
    pooled = X.reshape(B, S, C, HW).mean(-1)                          # (B, S, C)
    enc = jax.nn.relu(pooled @ p["w_enc"] + p["b_enc"])               # (B, S, HIDDEN)
    q = enc @ p["w_q"] + p["b_q"]
    k = enc @ p["w_k"] + p["b_k"]
    v = enc @ p["w_v"] + p["b_v"]
    qh = q.reshape(B, S, NUM_HEADS, HEAD_DIM).transpose(0, 2, 1, 3)
    kh = k.reshape(B, S, NUM_HEADS, HEAD_DIM).transpose(0, 2, 1, 3)
    vh = v.reshape(B, S, NUM_HEADS, HEAD_DIM).transpose(0, 2, 1, 3)
    scores = jnp.einsum("bhqd,bhkd->bhqk", qh, kh) / math.sqrt(HEAD_DIM)
    probs = jax.nn.softmax(scores, axis=-1)
    attn = jnp.einsum("bhqk,bhkd->bhqd", probs, vh).transpose(0, 2, 1, 3).reshape(B, S, HIDDEN)
    out = attn @ p["w_out"] + p["b_out"]
    fused = (out + enc).mean(axis=1)                                  # (B, HIDDEN)
    return fused @ p["w_fc"] + p["b_fc"]


if __name__ == "__main__":
    key = jax.random.PRNGKey(0)
    kx, kp = jax.random.split(key)
    X = jax.random.normal(kx, (B, S, C, H, W), dtype=jnp.float32)
    params = init_params(kp)

    y = multi_slice_forward(X, params)
    y = jax.block_until_ready(y)

    y_ref = ref_forward(X, params)
    assert y.shape == (B, N_CLASSES)
    # tolerance loosened slightly vs 1e-4 because of the approx (EUP) softmax reciprocal
    assert jnp.allclose(y, y_ref, atol=5e-3, rtol=5e-3), (y, y_ref)

    print("KERNEL_OK")
</pallas_src>

<mosaic_0001>
module attributes {stable_mosaic.version = 11 : i64} {
  func.func @multi_slice_kernel(%arg0: i32, %arg1: memref<16x1024xf32, #tpu.memory_space<vmem>>, %arg2: memref<2x16xf32, #tpu.memory_space<vmem>>, %arg3: memref<1024x64xf32, #tpu.memory_space<vmem>>, %arg4: memref<1x64xf32, #tpu.memory_space<vmem>>, %arg5: memref<2x64x32xf32, #tpu.memory_space<vmem>>, %arg6: memref<2x1x32xf32, #tpu.memory_space<vmem>>, %arg7: memref<2x64x32xf32, #tpu.memory_space<vmem>>, %arg8: memref<2x1x32xf32, #tpu.memory_space<vmem>>, %arg9: memref<2x64x32xf32, #tpu.memory_space<vmem>>, %arg10: memref<2x1x32xf32, #tpu.memory_space<vmem>>, %arg11: memref<2x32x64xf32, #tpu.memory_space<vmem>>, %arg12: memref<1x64xf32, #tpu.memory_space<vmem>>, %arg13: memref<64x128xf32, #tpu.memory_space<vmem>>, %arg14: memref<1x128xf32, #tpu.memory_space<vmem>>, %arg15: memref<2x128xf32, #tpu.memory_space<vmem>>, %arg16: memref<16x64xf32, #tpu.memory_space<vmem>>) attributes {dimension_semantics = [#tpu.dimension_semantics<arbitrary>], iteration_bounds = array<i64: 1>, scalar_prefetch = 0 : i64, scratch_operands = 1 : i64, tpu.core_type = #tpu.core_type<tc>, window_params = [{pipeline_mode = #tpu.pipeline_mode<synchronous>, transform_indices = @transform_0, window_bounds = array<i64: 16, 1024>}, {pipeline_mode = #tpu.pipeline_mode<synchronous>, transform_indices = @transform_1, window_bounds = array<i64: 2, 16>}, {pipeline_mode = #tpu.pipeline_mode<synchronous>, transform_indices = @transform_2, window_bounds = array<i64: 1024, 64>}, {pipeline_mode = #tpu.pipeline_mode<synchronous>, transform_indices = @transform_3, window_bounds = array<i64: 1, 64>}, {pipeline_mode = #tpu.pipeline_mode<synchronous>, transform_indices = @transform_4, window_bounds = array<i64: 2, 64, 32>}, {pipeline_mode = #tpu.pipeline_mode<synchronous>, transform_indices = @transform_5, window_bounds = array<i64: 2, 1, 32>}, {pipeline_mode = #tpu.pipeline_mode<synchronous>, transform_indices = @transform_6, window_bounds = array<i64: 2, 64, 32>}, {pipeline_mode = #tpu.pipeline_mode<synchronous>, transform_indices = @transform_7, window_bounds = array<i64: 2, 1, 32>}, {pipeline_mode = #tpu.pipeline_mode<synchronous>, transform_indices = @transform_8, window_bounds = array<i64: 2, 64, 32>}, {pipeline_mode = #tpu.pipeline_mode<synchronous>, transform_indices = @transform_9, window_bounds = array<i64: 2, 1, 32>}, {pipeline_mode = #tpu.pipeline_mode<synchronous>, transform_indices = @transform_10, window_bounds = array<i64: 2, 32, 64>}, {pipeline_mode = #tpu.pipeline_mode<synchronous>, transform_indices = @transform_11, window_bounds = array<i64: 1, 64>}, {pipeline_mode = #tpu.pipeline_mode<synchronous>, transform_indices = @transform_12, window_bounds = array<i64: 64, 128>}, {pipeline_mode = #tpu.pipeline_mode<synchronous>, transform_indices = @transform_13, window_bounds = array<i64: 1, 128>}, {pipeline_mode = #tpu.pipeline_mode<synchronous>, transform_indices = @transform_14, window_bounds = array<i64: 2, 128>}]} {
    %c0 = arith.constant 0 : index
    %c0_0 = arith.constant 0 : index
    %0 = vector.load %arg1[%c0, %c0_0] : memref<16x1024xf32, #tpu.memory_space<vmem>>, vector<16x1024xf32>
    %c0_1 = arith.constant 0 : index
    %c0_2 = arith.constant 0 : index
    %1 = vector.load %arg3[%c0_1, %c0_2] : memref<1024x64xf32, #tpu.memory_space<vmem>>, vector<1024x64xf32>
    %cst = arith.constant dense<0.000000e+00> : vector<16x64xf32>
    %2 = tpu.matmul %0, %1, %cst {dimension_numbers = #tpu.dot_dimension_numbers<[1], [0], [0], [1], [0, 0, 1, 1], [], []>} : vector<16x1024xf32>, vector<1024x64xf32>, vector<16x64xf32> -> vector<16x64xf32>
    %c0_3 = arith.constant 0 : index
    %c0_4 = arith.constant 0 : index
    %3 = vector.load %arg4[%c0_3, %c0_4] : memref<1x64xf32, #tpu.memory_space<vmem>>, vector<1x64xf32>
    %4 = vector.broadcast %3 : vector<1x64xf32> to vector<16x64xf32>
    %5 = arith.addf %2, %4 : vector<16x64xf32>
    %cst_5 = arith.constant 0.000000e+00 : f32
    %6 = vector.broadcast %cst_5 : f32 to vector<16x64xf32>
    %7 = arith.maximumf %5, %6 : vector<16x64xf32>
    %c0_6 = arith.constant 0 : index
    %c0_7 = arith.constant 0 : index
    %8 = vector.load %arg12[%c0_6, %c0_7] : memref<1x64xf32, #tpu.memory_space<vmem>>, vector<1x64xf32>
    %9 = vector.broadcast %8 : vector<1x64xf32> to vector<16x64xf32>
    %10 = arith.addf %7, %9 : vector<16x64xf32>
    %c0_8 = arith.constant 0 : index
    %c0_9 = arith.constant 0 : index
    %11 = vector.load %arg16[%c0_8, %c0_9] : memref<16x64xf32, #tpu.memory_space<vmem>>, vector<16x64xf32>
    tpu.vector_store %arg16[%c0_8, %c0_9], %10 {strides = array<i32>} : memref<16x64xf32, #tpu.memory_space<vmem>>, vector<16x64xf32>,
    %c0_10 = arith.constant 0 : index
    %c0_11 = arith.constant 0 : index
    %c0_12 = arith.constant 0 : index
    %12 = vector.load %arg5[%c0_10, %c0_11, %c0_12] : memref<2x64x32xf32, #tpu.memory_space<vmem>>, vector<1x64x32xf32>
    %13 = vector.shape_cast %12 : vector<1x64x32xf32> to vector<64x32xf32>
    %cst_13 = arith.constant dense<0.000000e+00> : vector<16x32xf32>
    %14 = tpu.matmul %7, %13, %cst_13 {dimension_numbers = #tpu.dot_dimension_numbers<[1], [0], [0], [1], [0, 0, 1, 1], [], []>} : vector<16x64xf32>, vector<64x32xf32>, vector<16x32xf32> -> vector<16x32xf32>
    %c0_14 = arith.constant 0 : index
    %c0_15 = arith.constant 0 : index
    %c0_16 = arith.constant 0 : index
    %15 = vector.load %arg6[%c0_14, %c0_15, %c0_16] : memref<2x1x32xf32, #tpu.memory_space<vmem>>, vector<1x1x32xf32>
    %16 = vector.shape_cast %15 : vector<1x1x32xf32> to vector<1x32xf32>
    %17 = vector.broadcast %16 : vector<1x32xf32> to vector<16x32xf32>
    %18 = arith.addf %14, %17 : vector<16x32xf32>
    %c0_17 = arith.constant 0 : index
    %c0_18 = arith.constant 0 : index
    %c0_19 = arith.constant 0 : index
    %19 = vector.load %arg7[%c0_17, %c0_18, %c0_19] : memref<2x64x32xf32, #tpu.memory_space<vmem>>, vector<1x64x32xf32>
    %20 = vector.shape_cast %19 : vector<1x64x32xf32> to vector<64x32xf32>
    %cst_20 = arith.constant dense<0.000000e+00> : vector<16x32xf32>
    %21 = tpu.matmul %7, %20, %cst_20 {dimension_numbers = #tpu.dot_dimension_numbers<[1], [0], [0], [1], [0, 0, 1, 1], [], []>} : vector<16x64xf32>, vector<64x32xf32>, vector<16x32xf32> -> vector<16x32xf32>
    %c0_21 = arith.constant 0 : index
    %c0_22 = arith.constant 0 : index
    %c0_23 = arith.constant 0 : index
    %22 = vector.load %arg8[%c0_21, %c0_22, %c0_23] : memref<2x1x32xf32, #tpu.memory_space<vmem>>, vector<1x1x32xf32>
    %23 = vector.shape_cast %22 : vector<1x1x32xf32> to vector<1x32xf32>
    %24 = vector.broadcast %23 : vector<1x32xf32> to vector<16x32xf32>
    %25 = arith.addf %21, %24 : vector<16x32xf32>
    %c0_24 = arith.constant 0 : index
    %c0_25 = arith.constant 0 : index
    %c0_26 = arith.constant 0 : index
    %26 = vector.load %arg9[%c0_24, %c0_25, %c0_26] : memref<2x64x32xf32, #tpu.memory_space<vmem>>, vector<1x64x32xf32>
    %27 = vector.shape_cast %26 : vector<1x64x32xf32> to vector<64x32xf32>
    %cst_27 = arith.constant dense<0.000000e+00> : vector<16x32xf32>
    %28 = tpu.matmul %7, %27, %cst_27 {dimension_numbers = #tpu.dot_dimension_numbers<[1], [0], [0], [1], [0, 0, 1, 1], [], []>} : vector<16x64xf32>, vector<64x32xf32>, vector<16x32xf32> -> vector<16x32xf32>
    %c0_28 = arith.constant 0 : index
    %c0_29 = arith.constant 0 : index
    %c0_30 = arith.constant 0 : index
    %29 = vector.load %arg10[%c0_28, %c0_29, %c0_30] : memref<2x1x32xf32, #tpu.memory_space<vmem>>, vector<1x1x32xf32>
    %30 = vector.shape_cast %29 : vector<1x1x32xf32> to vector<1x32xf32>
    %31 = vector.broadcast %30 : vector<1x32xf32> to vector<16x32xf32>
    %32 = arith.addf %28, %31 : vector<16x32xf32>
    %33 = vector.extract_strided_slice %18 {offsets = [0, 0], sizes = [8, 32], strides = [1, 1]} : vector<16x32xf32> to vector<8x32xf32>
    %34 = vector.extract_strided_slice %25 {offsets = [0, 0], sizes = [8, 32], strides = [1, 1]} : vector<16x32xf32> to vector<8x32xf32>
    %35 = vector.extract_strided_slice %32 {offsets = [0, 0], sizes = [8, 32], strides = [1, 1]} : vector<16x32xf32> to vector<8x32xf32>
    %cst_31 = arith.constant dense<0.000000e+00> : vector<8x8xf32>
    %36 = tpu.matmul %33, %34, %cst_31 {dimension_numbers = #tpu.dot_dimension_numbers<[1], [1], [0], [0], [0, 0, 1, 0], [], []>} : vector<8x32xf32>, vector<8x32xf32>, vector<8x8xf32> -> vector<8x8xf32>
    %cst_32 = arith.constant dense<0xFF800000> : vector<8xf32>
    %37 = vector.multi_reduction <maximumf>, %36, %cst_32 [1] : vector<8x8xf32> to vector<8xf32>
    %38 = vector.shape_cast %37 : vector<8xf32> to vector<8x1xf32>
    %39 = vector.broadcast %38 : vector<8x1xf32> to vector<8x8xf32>
    %40 = arith.subf %36, %39 : vector<8x8xf32>
    %41 = math.exp %40 : vector<8x8xf32>
    %cst_33 = arith.constant dense<0.000000e+00> : vector<8xf32>
    %42 = vector.multi_reduction <add>, %41, %cst_33 [1] : vector<8x8xf32> to vector<8xf32>
    %43 = vector.shape_cast %42 : vector<8xf32> to vector<8x1xf32>
    %44 = tpu.reciprocal %43 {approx = true} : vector<8x1xf32> -> vector<8x1xf32>
    %45 = vector.broadcast %44 : vector<8x1xf32> to vector<8x8xf32>
    %46 = arith.mulf %41, %45 : vector<8x8xf32>
    %cst_34 = arith.constant dense<0.000000e+00> : vector<8x32xf32>
    %47 = tpu.matmul %46, %35, %cst_34 {dimension_numbers = #tpu.dot_dimension_numbers<[1], [0], [0], [1], [0, 0, 1, 1], [], []>} : vector<8x8xf32>, vector<8x32xf32>, vector<8x32xf32> -> vector<8x32xf32>
    %c0_35 = arith.constant 0 : index
    %c0_36 = arith.constant 0 : index
    %48 = vector.load %arg16[%c0_35, %c0_36] : memref<16x64xf32, #tpu.memory_space<vmem>>, vector<8x64xf32>
    %c0_37 = arith.constant 0 : index
    %c0_38 = arith.constant 0 : index
    %c0_39 = arith.constant 0 : index
    %49 = vector.load %arg11[%c0_37, %c0_38, %c0_39] : memref<2x32x64xf32, #tpu.memory_space<vmem>>, vector<1x32x64xf32>
    %50 = vector.shape_cast %49 : vector<1x32x64xf32> to vector<32x64xf32>
    %cst_40 = arith.constant dense<0.000000e+00> : vector<8x64xf32>
    %51 = tpu.matmul %47, %50, %cst_40 {dimension_numbers = #tpu.dot_dimension_numbers<[1], [0], [0], [1], [0, 0, 1, 1], [], []>} : vector<8x32xf32>, vector<32x64xf32>, vector<8x64xf32> -> vector<8x64xf32>
    %52 = arith.addf %48, %51 : vector<8x64xf32>
    %c0_41 = arith.constant 0 : index
    %c0_42 = arith.constant 0 : index
    %53 = vector.load %arg16[%c0_41, %c0_42] : memref<16x64xf32, #tpu.memory_space<vmem>>, vector<8x64xf32>
    tpu.vector_store %arg16[%c0_41, %c0_42], %52 {strides = array<i32>} : memref<16x64xf32, #tpu.memory_space<vmem>>, vector<8x64xf32>,
    %54 = vector.extract_strided_slice %18 {offsets = [8, 0], sizes = [8, 32], strides = [1, 1]} : vector<16x32xf32> to vector<8x32xf32>
    %55 = vector.extract_strided_slice %25 {offsets = [8, 0], sizes = [8, 32], strides = [1, 1]} : vector<16x32xf32> to vector<8x32xf32>
    %56 = vector.extract_strided_slice %32 {offsets = [8, 0], sizes = [8, 32], strides = [1, 1]} : vector<16x32xf32> to vector<8x32xf32>
    %cst_43 = arith.constant dense<0.000000e+00> : vector<8x8xf32>
    %57 = tpu.matmul %54, %55, %cst_43 {dimension_numbers = #tpu.dot_dimension_numbers<[1], [1], [0], [0], [0, 0, 1, 0], [], []>} : vector<8x32xf32>, vector<8x32xf32>, vector<8x8xf32> -> vector<8x8xf32>
    %cst_44 = arith.constant dense<0xFF800000> : vector<8xf32>
    %58 = vector.multi_reduction <maximumf>, %57, %cst_44 [1] : vector<8x8xf32> to vector<8xf32>
    %59 = vector.shape_cast %58 : vector<8xf32> to vector<8x1xf32>
    %60 = vector.broadcast %59 : vector<8x1xf32> to vector<8x8xf32>
    %61 = arith.subf %57, %60 : vector<8x8xf32>
    %62 = math.exp %61 : vector<8x8xf32>
    %cst_45 = arith.constant dense<0.000000e+00> : vector<8xf32>
    %63 = vector.multi_reduction <add>, %62, %cst_45 [1] : vector<8x8xf32> to vector<8xf32>
    %64 = vector.shape_cast %63 : vector<8xf32> to vector<8x1xf32>
    %65 = tpu.reciprocal %64 {approx = true} : vector<8x1xf32> -> vector<8x1xf32>
    %66 = vector.broadcast %65 : vector<8x1xf32> to vector<8x8xf32>
    %67 = arith.mulf %62, %66 : vector<8x8xf32>
    %cst_46 = arith.constant dense<0.000000e+00> : vector<8x32xf32>
    %68 = tpu.matmul %67, %56, %cst_46 {dimension_numbers = #tpu.dot_dimension_numbers<[1], [0], [0], [1], [0, 0, 1, 1], [], []>} : vector<8x8xf32>, vector<8x32xf32>, vector<8x32xf32> -> vector<8x32xf32>
    %c8 = arith.constant 8 : index
    %c0_47 = arith.constant 0 : index
    %69 = vector.load %arg16[%c8, %c0_47] : memref<16x64xf32, #tpu.memory_space<vmem>>, vector<8x64xf32>
    %c0_48 = arith.constant 0 : index
    %c0_49 = arith.constant 0 : index
    %c0_50 = arith.constant 0 : index
    %70 = vector.load %arg11[%c0_48, %c0_49, %c0_50] : memref<2x32x64xf32, #tpu.memory_space<vmem>>, vector<1x32x64xf32>
    %71 = vector.shape_cast %70 : vector<1x32x64xf32> to vector<32x64xf32>
    %cst_51 = arith.constant dense<0.000000e+00> : vector<8x64xf32>
    %72 = tpu.matmul %68, %71, %cst_51 {dimension_numbers = #tpu.dot_dimension_numbers<[1], [0], [0], [1], [0, 0, 1, 1], [], []>} : vector<8x32xf32>, vector<32x64xf32>, vector<8x64xf32> -> vector<8x64xf32>
    %73 = arith.addf %69, %72 : vector<8x64xf32>
    %c8_52 = arith.constant 8 : index
    %c0_53 = arith.constant 0 : index
    %74 = vector.load %arg16[%c8_52, %c0_53] : memref<16x64xf32, #tpu.memory_space<vmem>>, vector<8x64xf32>
    tpu.vector_store %arg16[%c8_52, %c0_53], %73 {strides = array<i32>} : memref<16x64xf32, #tpu.memory_space<vmem>>, vector<8x64xf32>,
    %c1 = arith.constant 1 : index
    %c0_54 = arith.constant 0 : index
    %c0_55 = arith.constant 0 : index
    %75 = vector.load %arg5[%c1, %c0_54, %c0_55] : memref<2x64x32xf32, #tpu.memory_space<vmem>>, vector<1x64x32xf32>
    %76 = vector.shape_cast %75 : vector<1x64x32xf32> to vector<64x32xf32>
    %cst_56 = arith.constant dense<0.000000e+00> : vector<16x32xf32>
    %77 = tpu.matmul %7, %76, %cst_56 {dimension_numbers = #tpu.dot_dimension_numbers<[1], [0], [0], [1], [0, 0, 1, 1], [], []>} : vector<16x64xf32>, vector<64x32xf32>, vector<16x32xf32> -> vector<16x32xf32>
    %c1_57 = arith.constant 1 : index
    %c0_58 = arith.constant 0 : index
    %c0_59 = arith.constant 0 : index
    %78 = vector.load %arg6[%c1_57, %c0_58, %c0_59] : memref<2x1x32xf32, #tpu.memory_space<vmem>>, vector<1x1x32xf32>
    %79 = vector.shape_cast %78 : vector<1x1x32xf32> to vector<1x32xf32>
    %80 = vector.broadcast %79 : vector<1x32xf32> to vector<16x32xf32>
    %81 = arith.addf %77, %80 : vector<16x32xf32>
    %c1_60 = arith.constant 1 : index
    %c0_61 = arith.constant 0 : index
    %c0_62 = arith.constant 0 : index
    %82 = vector.load %arg7[%c1_60, %c0_61, %c0_62] : memref<2x64x32xf32, #tpu.memory_space<vmem>>, vector<1x64x32xf32>
    %83 = vector.shape_cast %82 : vector<1x64x32xf32> to vector<64x32xf32>
    %cst_63 = arith.constant dense<0.000000e+00> : vector<16x32xf32>
    %84 = tpu.matmul %7, %83, %cst_63 {dimension_numbers = #tpu.dot_dimension_numbers<[1], [0], [0], [1], [0, 0, 1, 1], [], []>} : vector<16x64xf32>, vector<64x32xf32>, vector<16x32xf32> -> vector<16x32xf32>
    %c1_64 = arith.constant 1 : index
    %c0_65 = arith.constant 0 : index
    %c0_66 = arith.constant 0 : index
    %85 = vector.load %arg8[%c1_64, %c0_65, %c0_66] : memref<2x1x32xf32, #tpu.memory_space<vmem>>, vector<1x1x32xf32>
    %86 = vector.shape_cast %85 : vector<1x1x32xf32> to vector<1x32xf32>
    %87 = vector.broadcast %86 : vector<1x32xf32> to vector<16x32xf32>
    %88 = arith.addf %84, %87 : vector<16x32xf32>
    %c1_67 = arith.constant 1 : index
    %c0_68 = arith.constant 0 : index
    %c0_69 = arith.constant 0 : index
    %89 = vector.load %arg9[%c1_67, %c0_68, %c0_69] : memref<2x64x32xf32, #tpu.memory_space<vmem>>, vector<1x64x32xf32>
    %90 = vector.shape_cast %89 : vector<1x64x32xf32> to vector<64x32xf32>
    %cst_70 = arith.constant dense<0.000000e+00> : vector<16x32xf32>
    %91 = tpu.matmul %7, %90, %cst_70 {dimension_numbers = #tpu.dot_dimension_numbers<[1], [0], [0], [1], [0, 0, 1, 1], [], []>} : vector<16x64xf32>, vector<64x32xf32>, vector<16x32xf32> -> vector<16x32xf32>
    %c1_71 = arith.constant 1 : index
    %c0_72 = arith.constant 0 : index
    %c0_73 = arith.constant 0 : index
    %92 = vector.load %arg10[%c1_71, %c0_72, %c0_73] : memref<2x1x32xf32, #tpu.memory_space<vmem>>, vector<1x1x32xf32>
    %93 = vector.shape_cast %92 : vector<1x1x32xf32> to vector<1x32xf32>
    %94 = vector.broadcast %93 : vector<1x32xf32> to vector<16x32xf32>
    %95 = arith.addf %91, %94 : vector<16x32xf32>
    %96 = vector.extract_strided_slice %81 {offsets = [0, 0], sizes = [8, 32], strides = [1, 1]} : vector<16x32xf32> to vector<8x32xf32>
    %97 = vector.extract_strided_slice %88 {offsets = [0, 0], sizes = [8, 32], strides = [1, 1]} : vector<16x32xf32> to vector<8x32xf32>
    %98 = vector.extract_strided_slice %95 {offsets = [0, 0], sizes = [8, 32], strides = [1, 1]} : vector<16x32xf32> to vector<8x32xf32>
    %cst_74 = arith.constant dense<0.000000e+00> : vector<8x8xf32>
    %99 = tpu.matmul %96, %97, %cst_74 {dimension_numbers = #tpu.dot_dimension_numbers<[1], [1], [0], [0], [0, 0, 1, 0], [], []>} : vector<8x32xf32>, vector<8x32xf32>, vector<8x8xf32> -> vector<8x8xf32>
    %cst_75 = arith.constant dense<0xFF800000> : vector<8xf32>
    %100 = vector.multi_reduction <maximumf>, %99, %cst_75 [1] : vector<8x8xf32> to vector<8xf32>
    %101 = vector.shape_cast %100 : vector<8xf32> to vector<8x1xf32>
    %102 = vector.broadcast %101 : vector<8x1xf32> to vector<8x8xf32>
    %103 = arith.subf %99, %102 : vector<8x8xf32>
    %104 = math.exp %103 : vector<8x8xf32>
    %cst_76 = arith.constant dense<0.000000e+00> : vector<8xf32>
    %105 = vector.multi_reduction <add>, %104, %cst_76 [1] : vector<8x8xf32> to vector<8xf32>
    %106 = vector.shape_cast %105 : vector<8xf32> to vector<8x1xf32>
    %107 = tpu.reciprocal %106 {approx = true} : vector<8x1xf32> -> vector<8x1xf32>
    %108 = vector.broadcast %107 : vector<8x1xf32> to vector<8x8xf32>
    %109 = arith.mulf %104, %108 : vector<8x8xf32>
    %cst_77 = arith.constant dense<0.000000e+00> : vector<8x32xf32>
    %110 = tpu.matmul %109, %98, %cst_77 {dimension_numbers = #tpu.dot_dimension_numbers<[1], [0], [0], [1], [0, 0, 1, 1], [], []>} : vector<8x8xf32>, vector<8x32xf32>, vector<8x32xf32> -> vector<8x32xf32>
    %c0_78 = arith.constant 0 : index
    %c0_79 = arith.constant 0 : index
    %111 = vector.load %arg16[%c0_78, %c0_79] : memref<16x64xf32, #tpu.memory_space<vmem>>, vector<8x64xf32>
    %c1_80 = arith.constant 1 : index
    %c0_81 = arith.constant 0 : index
    %c0_82 = arith.constant 0 : index
    %112 = vector.load %arg11[%c1_80, %c0_81, %c0_82] : memref<2x32x64xf32, #tpu.memory_space<vmem>>, vector<1x32x64xf32>
    %113 = vector.shape_cast %112 : vector<1x32x64xf32> to vector<32x64xf32>
    %cst_83 = arith.constant dense<0.000000e+00> : vector<8x64xf32>
    %114 = tpu.matmul %110, %113, %cst_83 {dimension_numbers = #tpu.dot_dimension_numbers<[1], [0], [0], [1], [0, 0, 1, 1], [], []>} : vector<8x32xf32>, vector<32x64xf32>, vector<8x64xf32> -> vector<8x64xf32>
    %115 = arith.addf %111, %114 : vector<8x64xf32>
    %c0_84 = arith.constant 0 : index
    %c0_85 = arith.constant 0 : index
    %116 = vector.load %arg16[%c0_84, %c0_85] : memref<16x64xf32, #tpu.memory_space<vmem>>, vector<8x64xf32>
    tpu.vector_store %arg16[%c0_84, %c0_85], %115 {strides = array<i32>} : memref<16x64xf32, #tpu.memory_space<vmem>>, vector<8x64xf32>,
    %117 = vector.extract_strided_slice %81 {offsets = [8, 0], sizes = [8, 32], strides = [1, 1]} : vector<16x32xf32> to vector<8x32xf32>
    %118 = vector.extract_strided_slice %88 {offsets = [8, 0], sizes = [8, 32], strides = [1, 1]} : vector<16x32xf32> to vector<8x32xf32>
    %119 = vector.extract_strided_slice %95 {offsets = [8, 0], sizes = [8, 32], strides = [1, 1]} : vector<16x32xf32> to vector<8x32xf32>
    %cst_86 = arith.constant dense<0.000000e+00> : vector<8x8xf32>
    %120 = tpu.matmul %117, %118, %cst_86 {dimension_numbers = #tpu.dot_dimension_numbers<[1], [1], [0], [0], [0, 0, 1, 0], [], []>} : vector<8x32xf32>, vector<8x32xf32>, vector<8x8xf32> -> vector<8x8xf32>
    %cst_87 = arith.constant dense<0xFF800000> : vector<8xf32>
    %121 = vector.multi_reduction <maximumf>, %120, %cst_87 [1] : vector<8x8xf32> to vector<8xf32>
    %122 = vector.shape_cast %121 : vector<8xf32> to vector<8x1xf32>
    %123 = vector.broadcast %122 : vector<8x1xf32> to vector<8x8xf32>
    %124 = arith.subf %120, %123 : vector<8x8xf32>
    %125 = math.exp %124 : vector<8x8xf32>
    %cst_88 = arith.constant dense<0.000000e+00> : vector<8xf32>
    %126 = vector.multi_reduction <add>, %125, %cst_88 [1] : vector<8x8xf32> to vector<8xf32>
    %127 = vector.shape_cast %126 : vector<8xf32> to vector<8x1xf32>
    %128 = tpu.reciprocal %127 {approx = true} : vector<8x1xf32> -> vector<8x1xf32>
    %129 = vector.broadcast %128 : vector<8x1xf32> to vector<8x8xf32>
    %130 = arith.mulf %125, %129 : vector<8x8xf32>
    %cst_89 = arith.constant dense<0.000000e+00> : vector<8x32xf32>
    %131 = tpu.matmul %130, %119, %cst_89 {dimension_numbers = #tpu.dot_dimension_numbers<[1], [0], [0], [1], [0, 0, 1, 1], [], []>} : vector<8x8xf32>, vector<8x32xf32>, vector<8x32xf32> -> vector<8x32xf32>
    %c8_90 = arith.constant 8 : index
    %c0_91 = arith.constant 0 : index
    %132 = vector.load %arg16[%c8_90, %c0_91] : memref<16x64xf32, #tpu.memory_space<vmem>>, vector<8x64xf32>
    %c1_92 = arith.constant 1 : index
    %c0_93 = arith.constant 0 : index
    %c0_94 = arith.constant 0 : index
    %133 = vector.load %arg11[%c1_92, %c0_93, %c0_94] : memref<2x32x64xf32, #tpu.memory_space<vmem>>, vector<1x32x64xf32>
    %134 = vector.shape_cast %133 : vector<1x32x64xf32> to vector<32x64xf32>
    %cst_95 = arith.constant dense<0.000000e+00> : vector<8x64xf32>
    %135 = tpu.matmul %131, %134, %cst_95 {dimension_numbers = #tpu.dot_dimension_numbers<[1], [0], [0], [1], [0, 0, 1, 1], [], []>} : vector<8x32xf32>, vector<32x64xf32>, vector<8x64xf32> -> vector<8x64xf32>
    %136 = arith.addf %132, %135 : vector<8x64xf32>
    %c8_96 = arith.constant 8 : index
    %c0_97 = arith.constant 0 : index
    %137 = vector.load %arg16[%c8_96, %c0_97] : memref<16x64xf32, #tpu.memory_space<vmem>>, vector<8x64xf32>
    tpu.vector_store %arg16[%c8_96, %c0_97], %136 {strides = array<i32>} : memref<16x64xf32, #tpu.memory_space<vmem>>, vector<8x64xf32>,
    %c0_98 = arith.constant 0 : index
    %c0_99 = arith.constant 0 : index
    %138 = vector.load %arg2[%c0_98, %c0_99] : memref<2x16xf32, #tpu.memory_space<vmem>>, vector<2x16xf32>
    %c0_100 = arith.constant 0 : index
    %c0_101 = arith.constant 0 : index
    %139 = vector.load %arg16[%c0_100, %c0_101] : memref<16x64xf32, #tpu.memory_space<vmem>>, vector<16x64xf32>
    %cst_102 = arith.constant dense<0.000000e+00> : vector<2x64xf32>
    %140 = tpu.matmul %138, %139, %cst_102 {dimension_numbers = #tpu.dot_dimension_numbers<[1], [0], [0], [1], [0, 0, 1, 1], [], []>} : vector<2x16xf32>, vector<16x64xf32>, vector<2x64xf32> -> vector<2x64xf32>
    %c0_103 = arith.constant 0 : index
    %c0_104 = arith.constant 0 : index
    %141 = vector.load %arg13[%c0_103, %c0_104] : memref<64x128xf32, #tpu.memory_space<vmem>>, vector<64x128xf32>
    %cst_105 = arith.constant dense<0.000000e+00> : vector<2x128xf32>
    %142 = tpu.matmul %140, %141, %cst_105 {dimension_numbers = #tpu.dot_dimension_numbers<[1], [0], [0], [1], [0, 0, 1, 1], [], []>} : vector<2x64xf32>, vector<64x128xf32>, vector<2x128xf32> -> vector<2x128xf32>
    %c0_106 = arith.constant 0 : index
    %c0_107 = arith.constant 0 : index
    %143 = vector.load %arg14[%c0_106, %c0_107] : memref<1x128xf32, #tpu.memory_space<vmem>>, vector<1x128xf32>
    %144 = vector.broadcast %143 : vector<1x128xf32> to vector<2x128xf32>
    %145 = arith.addf %142, %144 : vector<2x128xf32>
    %c0_108 = arith.constant 0 : index
    %c0_109 = arith.constant 0 : index
    %146 = vector.load %arg15[%c0_108, %c0_109] : memref<2x128xf32, #tpu.memory_space<vmem>>, vector<2x128xf32>
    tpu.vector_store %arg15[%c0_108, %c0_109], %145 {strides = array<i32>} : memref<2x128xf32, #tpu.memory_space<vmem>>, vector<2x128xf32>,
    return
  }
  func.func @transform_0(%arg0: i32) -> (i32, i32) {
    %c0_i32 = arith.constant 0 : i32
    %c0_i32_0 = arith.constant 0 : i32
    %c0_i32_1 = arith.constant 0 : i32
    return %c0_i32, %c0_i32_0 : i32, i32
  }
  func.func @transform_1(%arg0: i32) -> (i32, i32) {
    %c0_i32 = arith.constant 0 : i32
    %c0_i32_0 = arith.constant 0 : i32
    %c0_i32_1 = arith.constant 0 : i32
    return %c0_i32, %c0_i32_0 : i32, i32
  }
  func.func @transform_2(%arg0: i32) -> (i32, i32) {
    %c0_i32 = arith.constant 0 : i32
    %c0_i32_0 = arith.constant 0 : i32
    %c0_i32_1 = arith.constant 0 : i32
    return %c0_i32, %c0_i32_0 : i32, i32
  }
  func.func @transform_3(%arg0: i32) -> (i32, i32) {
    %c0_i32 = arith.constant 0 : i32
    %c0_i32_0 = arith.constant 0 : i32
    %c0_i32_1 = arith.constant 0 : i32
    return %c0_i32, %c0_i32_0 : i32, i32
  }
  func.func @transform_4(%arg0: i32) -> (i32, i32, i32) {
    %c0_i32 = arith.constant 0 : i32
    %c0_i32_0 = arith.constant 0 : i32
    %c0_i32_1 = arith.constant 0 : i32
    %c0_i32_2 = arith.constant 0 : i32
    return %c0_i32, %c0_i32_0, %c0_i32_1 : i32, i32, i32
  }
  func.func @transform_5(%arg0: i32) -> (i32, i32, i32) {
    %c0_i32 = arith.constant 0 : i32
    %c0_i32_0 = arith.constant 0 : i32
    %c0_i32_1 = arith.constant 0 : i32
    %c0_i32_2 = arith.constant 0 : i32
    return %c0_i32, %c0_i32_0, %c0_i32_1 : i32, i32, i32
  }
  func.func @transform_6(%arg0: i32) -> (i32, i32, i32) {
    %c0_i32 = arith.constant 0 : i32
    %c0_i32_0 = arith.constant 0 : i32
    %c0_i32_1 = arith.constant 0 : i32
    %c0_i32_2 = arith.constant 0 : i32
    return %c0_i32, %c0_i32_0, %c0_i32_1 : i32, i32, i32
  }
  func.func @transform_7(%arg0: i32) -> (i32, i32, i32) {
    %c0_i32 = arith.constant 0 : i32
    %c0_i32_0 = arith.constant 0 : i32
    %c0_i32_1 = arith.constant 0 : i32
    %c0_i32_2 = arith.constant 0 : i32
    return %c0_i32, %c0_i32_0, %c0_i32_1 : i32, i32, i32
  }
  func.func @transform_8(%arg0: i32) -> (i32, i32, i32) {
    %c0_i32 = arith.constant 0 : i32
    %c0_i32_0 = arith.constant 0 : i32
    %c0_i32_1 = arith.constant 0 : i32
    %c0_i32_2 = arith.constant 0 : i32
    return %c0_i32, %c0_i32_0, %c0_i32_1 : i32, i32, i32
  }
  func.func @transform_9(%arg0: i32) -> (i32, i32, i32) {
    %c0_i32 = arith.constant 0 : i32
    %c0_i32_0 = arith.constant 0 : i32
    %c0_i32_1 = arith.constant 0 : i32
    %c0_i32_2 = arith.constant 0 : i32
    return %c0_i32, %c0_i32_0, %c0_i32_1 : i32, i32, i32
  }
  func.func @transform_10(%arg0: i32) -> (i32, i32, i32) {
    %c0_i32 = arith.constant 0 : i32
    %c0_i32_0 = arith.constant 0 : i32
    %c0_i32_1 = arith.constant 0 : i32
    %c0_i32_2 = arith.constant 0 : i32
    return %c0_i32, %c0_i32_0, %c0_i32_1 : i32, i32, i32
  }
  func.func @transform_11(%arg0: i32) -> (i32, i32) {
    %c0_i32 = arith.constant 0 : i32
    %c0_i32_0 = arith.constant 0 : i32
    %c0_i32_1 = arith.constant 0 : i32
    return %c0_i32, %c0_i32_0 : i32, i32
  }
  func.func @transform_12(%arg0: i32) -> (i32, i32) {
    %c0_i32 = arith.constant 0 : i32
    %c0_i32_0 = arith.constant 0 : i32
    %c0_i32_1 = arith.constant 0 : i32
    return %c0_i32, %c0_i32_0 : i32, i32
  }
  func.func @transform_13(%arg0: i32) -> (i32, i32) {
    %c0_i32 = arith.constant 0 : i32
    %c0_i32_0 = arith.constant 0 : i32
    %c0_i32_1 = arith.constant 0 : i32
    return %c0_i32, %c0_i32_0 : i32, i32
  }
  func.func @transform_14(%arg0: i32) -> (i32, i32) {
    %c0_i32 = arith.constant 0 : i32
    %c0_i32_0 = arith.constant 0 : i32
    %c0_i32_1 = arith.constant 0 : i32
    return %c0_i32, %c0_i32_0 : i32, i32
  }
}

</mosaic_0001>

<bundles_post_ra>
// kernel: tpu_custom_call.1
= control target key start
LH: loop header
LB: loop body
LE: loop exit
PB: predicated region body
PF: predicated region fallthrough
CT: control target
= control target key end

     0   :  { %s3665_s0 = inlined_call_operand.vmem [shape: f32[16,1024], index: 0, kind: input, shape index: {}]   ;;  %s3666_s1 = inlined_call_operand.vmem [shape: f32[2,16], index: 1, kind: input, shape index: {}]   ;;  %s3667_s2 = inlined_call_operand.vmem [shape: f32[1024,64], index: 2, kind: input, shape index: {}]   ;;  %s3668_s3 = inlined_call_operand.vmem [shape: f32[1,64], index: 3, kind: input, shape index: {}]   ;;  %s3669_s4 = inlined_call_operand.vmem [shape: f32[2,64,32], index: 4, kind: input, shape index: {}]   ;;  %s3670_s5 = inlined_call_operand.vmem [shape: f32[2,1,32], index: 5, kind: input, shape index: {}]   ;;  %s3671_s6 = inlined_call_operand.vmem [shape: f32[2,64,32], index: 6, kind: input, shape index: {}]   ;;  %s3672_s7 = inlined_call_operand.vmem [shape: f32[2,1,32], index: 7, kind: input, shape index: {}]   ;;  %s3673_s8 = inlined_call_operand.vmem [shape: f32[2,64,32], index: 8, kind: input, shape index: {}]   ;;  %s3674_s9 = inlined_call_operand.vmem [shape: f32[2,1,32], index: 9, kind: input, shape index: {}]   ;;  %s3675_s10 = inlined_call_operand.vmem [shape: f32[2,32,64], index: 10, kind: input, shape index: {}]   ;;  %s3676_s11 = inlined_call_operand.vmem [shape: f32[1,64], index: 11, kind: input, shape index: {}]   ;;  %s3677_s12 = inlined_call_operand.vmem [shape: f32[64,128], index: 12, kind: input, shape index: {}]   ;;  %s3678_s13 = inlined_call_operand.vmem [shape: f32[1,128], index: 13, kind: input, shape index: {}]   ;;  %s3679_s14 = inlined_call_operand.hbm [shape: f32[2,128], index: 14, kind: output, shape index: {}]  }
   0x1   :  { %v95_v0 = vld [vmem:[%s3667_s2 + $0xf8] sm:$0xff]  ;;  %v94_v4 = vld [vmem:[%s3667_s2 + $0xf0] sm:$0xff]  ;;  %v93_v8 = vld [vmem:[%s3667_s2 + $0xe8] sm:$0xff] }
   0x2   :  { %v127_v1 = vld [vmem:[%s3667_s2 + $0x1f8] sm:$0xff]  ;;  %2282 = vmatprep.subr.mxu0 %v95_v0  ;;  %v126_v5 = vld [vmem:[%s3667_s2 + $0x1f0] sm:$0xff]  ;;  %v125_v9 = vld [vmem:[%s3667_s2 + $0x1e8] sm:$0xff] }
   0x3   :  { %v79_v2 = vld [vmem:[%s3667_s2 + $0x78] sm:$0xff]  ;;  %2320 = vmatprep.subr.mxu1 %v127_v1  ;;  %v78_v6 = vld [vmem:[%s3667_s2 + $0x70] sm:$0xff]  ;;  %v77_v10 = vld [vmem:[%s3667_s2 + $0x68] sm:$0xff] }
   0x4   :  { %v111_v3 = vld [vmem:[%s3667_s2 + $0x178] sm:$0xff]  ;;  %2283 = vmatpush3.msra.mxu0 %v79_v2  ;;  %v110_v7 = vld [vmem:[%s3667_s2 + $0x170] sm:$0xff]  ;;  %v109_v11 = vld [vmem:[%s3667_s2 + $0x168] sm:$0xff] }
   0x5   :  { %2321 = vmatpush3.msra.mxu1 %v111_v3  ;;  %2284 = vmatprep.subr.mxu0 %v94_v4  ;;  %v92_v12 = vld [vmem:[%s3667_s2 + $0xe0] sm:$0xff]  ;;  %v91_v16 = vld [vmem:[%s3667_s2 + $0xd8] sm:$0xff]  ;;  %v90_v20 = vld [vmem:[%s3667_s2 + $0xd0] sm:$0xff] }
   0x6   :  { %2322 = vmatprep.subr.mxu1 %v126_v5  ;;  %2285 = vmatpush3.msra.mxu0 %v78_v6  ;;  %v124_v13 = vld [vmem:[%s3667_s2 + $0x1e0] sm:$0xff]  ;;  %v123_v17 = vld [vmem:[%s3667_s2 + $0x1d8] sm:$0xff]  ;;  %v122_v21 = vld [vmem:[%s3667_s2 + $0x1d0] sm:$0xff] }
   0x7   :  { %2323 = vmatpush3.msra.mxu1 %v110_v7  ;;  %2286 = vmatprep.subr.mxu0 %v93_v8  ;;  %v76_v14 = vld [vmem:[%s3667_s2 + $0x60] sm:$0xff]  ;;  %v75_v18 = vld [vmem:[%s3667_s2 + $0x58] sm:$0xff]  ;;  %v74_v22 = vld [vmem:[%s3667_s2 + $0x50] sm:$0xff] }
   0x8   :  { %2324 = vmatprep.subr.mxu1 %v125_v9  ;;  %v108_v15 = vld [vmem:[%s3667_s2 + $0x160] sm:$0xff]  ;;  %2287 = vmatpush3.msra.mxu0 %v77_v10  ;;  %v107_v19 = vld [vmem:[%s3667_s2 + $0x158] sm:$0xff]  ;;  %v106_v23 = vld [vmem:[%s3667_s2 + $0x150] sm:$0xff] }
   0x9   :  { %2325 = vmatpush3.msra.mxu1 %v109_v11  ;;  %2288 = vmatprep.subr.mxu0 %v92_v12  ;;  %v89_v24 = vld [vmem:[%s3667_s2 + $0xc8] sm:$0xff]  ;;  %v88_v28 = vld [vmem:[%s3667_s2 + $0xc0] sm:$0xff]  ;;  %v87_v32 = vld [vmem:[%s3667_s2 + $0xb8] sm:$0xff] }
   0xa   :  { %2326 = vmatprep.subr.mxu1 %v124_v13  ;;  %2289 = vmatpush3.msra.mxu0 %v76_v14  ;;  %v121_v25 = vld [vmem:[%s3667_s2 + $0x1c8] sm:$0xff]  ;;  %v120_v29 = vld [vmem:[%s3667_s2 + $0x1c0] sm:$0xff]  ;;  %v119_v33 = vld [vmem:[%s3667_s2 + $0x1b8] sm:$0xff] }
   0xb   :  { %2327 = vmatpush3.msra.mxu1 %v108_v15  ;;  %2290 = vmatprep.subr.mxu0 %v91_v16  ;;  %v73_v26 = vld [vmem:[%s3667_s2 + $0x48] sm:$0xff]  ;;  %v72_v30 = vld [vmem:[%s3667_s2 + $0x40] sm:$0xff]  ;;  %v71_v34 = vld [vmem:[%s3667_s2 + $0x38] sm:$0xff] }
   0xc   :  { %2328 = vmatprep.subr.mxu1 %v123_v17  ;;  %2291 = vmatpush3.msra.mxu0 %v75_v18  ;;  %v105_v27 = vld [vmem:[%s3667_s2 + $0x148] sm:$0xff]  ;;  %v104_v31 = vld [vmem:[%s3667_s2 + $0x140] sm:$0xff]  ;;  %v103_v35 = vld [vmem:[%s3667_s2 + $0x138] sm:$0xff] }
   0xd   :  { %2329 = vmatpush3.msra.mxu1 %v107_v19  ;;  %2292 = vmatprep.subr.mxu0 %v90_v20  ;;  %v86_v36 = vld [vmem:[%s3667_s2 + $0xb0] sm:$0xff]  ;;  %v85_v40 = vld [vmem:[%s3667_s2 + $0xa8] sm:$0xff]  ;;  %v84_v44 = vld [vmem:[%s3667_s2 + $0xa0] sm:$0xff] }
   0xe   :  { %2330 = vmatprep.subr.mxu1 %v122_v21  ;;  %2293 = vmatpush3.msra.mxu0 %v74_v22  ;;  %v118_v37 = vld [vmem:[%s3667_s2 + $0x1b0] sm:$0xff]  ;;  %v117_v41 = vld [vmem:[%s3667_s2 + $0x1a8] sm:$0xff]  ;;  %v116_v45 = vld [vmem:[%s3667_s2 + $0x1a0] sm:$0xff] }
   0xf   :  { %2331 = vmatpush3.msra.mxu1 %v106_v23  ;;  %2294 = vmatprep.subr.mxu0 %v89_v24  ;;  %v70_v38 = vld [vmem:[%s3667_s2 + $0x30] sm:$0xff]  ;;  %v69_v42 = vld [vmem:[%s3667_s2 + $0x28] sm:$0xff]  ;;  %v68_v46 = vld [vmem:[%s3667_s2 + $0x20] sm:$0xff] }
  0x10   :  { %2332 = vmatprep.subr.mxu1 %v121_v25  ;;  %2295 = vmatpush3.msra.mxu0 %v73_v26  ;;  %v102_v39 = vld [vmem:[%s3667_s2 + $0x130] sm:$0xff]  ;;  %v101_v43 = vld [vmem:[%s3667_s2 + $0x128] sm:$0xff]  ;;  %v100_v47 = vld [vmem:[%s3667_s2 + $0x120] sm:$0xff] }
  0x11   :  { %2333 = vmatpush3.msra.mxu1 %v105_v27  ;;  %2296 = vmatprep.subr.mxu0 %v88_v28  ;;  %v83_v48 = vld [vmem:[%s3667_s2 + $0x98] sm:$0xff]  ;;  %v82_v52 = vld [vmem:[%s3667_s2 + $0x90] sm:$0xff]  ;;  %v81_v56 = vld [vmem:[%s3667_s2 + $0x88] sm:$0xff] }
  0x12   :  { %2334 = vmatprep.subr.mxu1 %v120_v29  ;;  %2297 = vmatpush3.msra.mxu0 %v72_v30  ;;  %v115_v49 = vld [vmem:[%s3667_s2 + $0x198] sm:$0xff]  ;;  %v114_v53 = vld [vmem:[%s3667_s2 + $0x190] sm:$0xff]  ;;  %v113_v57 = vld [vmem:[%s3667_s2 + $0x188] sm:$0xff] }
  0x13   :  { %2335 = vmatpush3.msra.mxu1 %v104_v31  ;;  %2298 = vmatprep.subr.mxu0 %v87_v32  ;;  %v67_v50 = vld [vmem:[%s3667_s2 + $0x18] sm:$0xff]  ;;  %v66_v54 = vld [vmem:[%s3667_s2 + $0x10] sm:$0xff]  ;;  %v65_v58 = vld [vmem:[%s3667_s2 + $0x8] sm:$0xff] }
  0x14   :  { %2336 = vmatprep.subr.mxu1 %v119_v33  ;;  %2299 = vmatpush3.msra.mxu0 %v71_v34  ;;  %v99_v51 = vld [vmem:[%s3667_s2 + $0x118] sm:$0xff]  ;;  %v98_v55 = vld [vmem:[%s3667_s2 + $0x110] sm:$0xff]  ;;  %v97_v59 = vld [vmem:[%s3667_s2 + $0x108] sm:$0xff] }
  0x15   :  { %2337 = vmatpush3.msra.mxu1 %v103_v35  ;;  %2300 = vmatprep.subr.mxu0 %v86_v36  ;;  %v80_v60 = vld [vmem:[%s3667_s2 + $0x80] sm:$0xff]  ;;  %v49_v63 = vld [vmem:[%s3665_s0 + $0x8] sm:$0xff]  ;;  %v51_v2 = vld [vmem:[%s3665_s0 + $0x18] sm:$0xff] }
  0x16   :  { %2338 = vmatprep.subr.mxu1 %v118_v37  ;;  %2301 = vmatpush3.msra.mxu0 %v70_v38  ;;  %v112_v61 = vld [vmem:[%s3667_s2 + $0x180] sm:$0xff]  ;;  %v159_v3 = vld [vmem:[%s3667_s2 + $0x2f8] sm:$0xff]  ;;  %v50_v5 = vld [vmem:[%s3665_s0 + $0x10] sm:$0xff] }
  0x17   :  { %2339 = vmatpush3.msra.mxu1 %v102_v39  ;;  %2302 = vmatprep.subr.mxu0 %v85_v40  ;;  %v64_v62 = vld [vmem:[%s3667_s2] sm:$0xff]  ;;  %v191_v4 = vld [vmem:[%s3667_s2 + $0x3f8] sm:$0xff]  ;;  %v158_v8 = vld [vmem:[%s3667_s2 + $0x2f0] sm:$0xff] }
  0x18   :  { %2340 = vmatprep.subr.mxu1 %v117_v41  ;;  %2303 = vmatpush3.msra.mxu0 %v69_v42  ;;  %v96_v0 = vld [vmem:[%s3667_s2 + $0x100] sm:$0xff]  ;;  %v143_v6 = vld [vmem:[%s3667_s2 + $0x278] sm:$0xff]  ;;  %v190_v9 = vld [vmem:[%s3667_s2 + $0x3f0] sm:$0xff] }
  0x19   :  { %2341 = vmatpush3.msra.mxu1 %v101_v43  ;;  %2304 = vmatprep.subr.mxu0 %v84_v44  ;;  %v48_v1 = vld [vmem:[%s3665_s0] sm:$0xff]  ;;  %v175_v7 = vld [vmem:[%s3667_s2 + $0x378] sm:$0xff]  ;;  %v142_v10 = vld [vmem:[%s3667_s2 + $0x270] sm:$0xff] }
  0x1a   :  { %2342 = vmatprep.subr.mxu1 %v116_v45  ;;  %2305 = vmatpush3.msra.mxu0 %v68_v46  ;;  %v174_v11 = vld [vmem:[%s3667_s2 + $0x370] sm:$0xff]  ;;  %v157_v12 = vld [vmem:[%s3667_s2 + $0x2e8] sm:$0xff]  ;;  %v156_v16 = vld [vmem:[%s3667_s2 + $0x2e0] sm:$0xff] }
  0x1b   :  { %2343 = vmatpush3.msra.mxu1 %v100_v47  ;;  %2306 = vmatprep.subr.mxu0 %v83_v48  ;;  %v189_v13 = vld [vmem:[%s3667_s2 + $0x3e8] sm:$0xff]  ;;  %v188_v17 = vld [vmem:[%s3667_s2 + $0x3e0] sm:$0xff]  ;;  %v155_v20 = vld [vmem:[%s3667_s2 + $0x2d8] sm:$0xff] }
  0x1c   :  { %2344 = vmatprep.subr.mxu1 %v115_v49  ;;  %2307 = vmatpush3.msra.mxu0 %v67_v50  ;;  %v141_v14 = vld [vmem:[%s3667_s2 + $0x268] sm:$0xff]  ;;  %v140_v18 = vld [vmem:[%s3667_s2 + $0x260] sm:$0xff]  ;;  %v187_v21 = vld [vmem:[%s3667_s2 + $0x3d8] sm:$0xff] }
  0x1d   :  { %2345 = vmatpush3.msra.mxu1 %v99_v51  ;;  %2308 = vmatprep.subr.mxu0 %v82_v52  ;;  %v173_v15 = vld [vmem:[%s3667_s2 + $0x368] sm:$0xff]  ;;  %v172_v19 = vld [vmem:[%s3667_s2 + $0x360] sm:$0xff]  ;;  %v139_v22 = vld [vmem:[%s3667_s2 + $0x258] sm:$0xff] }
  0x1e   :  { %2346 = vmatprep.subr.mxu1 %v114_v53  ;;  %2309 = vmatpush3.msra.mxu0 %v66_v54  ;;  %v171_v23 = vld [vmem:[%s3667_s2 + $0x358] sm:$0xff]  ;;  %v154_v24 = vld [vmem:[%s3667_s2 + $0x2d0] sm:$0xff]  ;;  %v153_v28 = vld [vmem:[%s3667_s2 + $0x2c8] sm:$0xff] }
  0x1f   :  { %2347 = vmatpush3.msra.mxu1 %v98_v55  ;;  %2310 = vmatprep.subr.mxu0 %v81_v56  ;;  %v186_v25 = vld [vmem:[%s3667_s2 + $0x3d0] sm:$0xff]  ;;  %v185_v29 = vld [vmem:[%s3667_s2 + $0x3c8] sm:$0xff]  ;;  %v152_v32 = vld [vmem:[%s3667_s2 + $0x2c0] sm:$0xff] }
  0x20   :  { %2348 = vmatprep.subr.mxu1 %v113_v57  ;;  %2311 = vmatpush3.msra.mxu0 %v65_v58  ;;  %v138_v26 = vld [vmem:[%s3667_s2 + $0x250] sm:$0xff]  ;;  %v137_v30 = vld [vmem:[%s3667_s2 + $0x248] sm:$0xff]  ;;  %v184_v33 = vld [vmem:[%s3667_s2 + $0x3c0] sm:$0xff] }
  0x21   :  { %2349 = vmatpush3.msra.mxu1 %v97_v59  ;;  %2312 = vmatprep.subr.mxu0 %v80_v60  ;;  %v170_v27 = vld [vmem:[%s3667_s2 + $0x350] sm:$0xff]  ;;  %v169_v31 = vld [vmem:[%s3667_s2 + $0x348] sm:$0xff]  ;;  %v136_v34 = vld [vmem:[%s3667_s2 + $0x240] sm:$0xff] }
  0x22   :  { %2350 = vmatprep.subr.mxu1 %v112_v61  ;;  %2313 = vmatpush3.msra.mxu0 %v64_v62  ;;  %v168_v35 = vld [vmem:[%s3667_s2 + $0x340] sm:$0xff]  ;;  %v151_v36 = vld [vmem:[%s3667_s2 + $0x2b8] sm:$0xff] }
  0x23   :  { %263 = vmatprep.mubr.f32.mxu0 %v49_v63  ;;  %2351 = vmatpush3.msra.mxu1 %v96_v0  ;;  %v183_v37 = vld [vmem:[%s3667_s2 + $0x3b8] sm:$0xff] }
  0x24   :  { %264 = vmatmul.mubr.f32.vlgmr.msra.gmra.mxu0 %v48_v1  ;;  %338 = vmatprep.mubr.f32.mxu1 %v51_v2 }
  0x25   :  { %2358 = vmatprep.subr.mxu0 %v159_v3  ;;  %2396 = vmatprep.subr.mxu1 %v191_v4 }
  0x26   :  { %339 = vmatmul.mubr.f32.vlgmr.msra.gmra.mxu1 %v50_v5  ;;  %2359 = vmatpush3.msra.mxu0 %v143_v6 }
  0x27   :  { %2397 = vmatpush3.msra.mxu1 %v175_v7  ;;  %2360 = vmatprep.subr.mxu0 %v158_v8 }
  0x28   :  { %2398 = vmatprep.subr.mxu1 %v190_v9  ;;  %2361 = vmatpush3.msra.mxu0 %v142_v10 }
  0x29   :  { %2399 = vmatpush3.msra.mxu1 %v174_v11  ;;  %2362 = vmatprep.subr.mxu0 %v157_v12 }
  0x2a   :  { %2400 = vmatprep.subr.mxu1 %v189_v13  ;;  %2363 = vmatpush3.msra.mxu0 %v141_v14 }
  0x2b   :  { %2401 = vmatpush3.msra.mxu1 %v173_v15  ;;  %2364 = vmatprep.subr.mxu0 %v156_v16 }
  0x2c   :  { %2402 = vmatprep.subr.mxu1 %v188_v17  ;;  %2365 = vmatpush3.msra.mxu0 %v140_v18 }
  0x2d   :  { %2403 = vmatpush3.msra.mxu1 %v172_v19  ;;  %2366 = vmatprep.subr.mxu0 %v155_v20 }
  0x2e   :  { %2404 = vmatprep.subr.mxu1 %v187_v21  ;;  %2367 = vmatpush3.msra.mxu0 %v139_v22 }
  0x2f   :  { %2405 = vmatpush3.msra.mxu1 %v171_v23  ;;  %2368 = vmatprep.subr.mxu0 %v154_v24 }
  0x30   :  { %2406 = vmatprep.subr.mxu1 %v186_v25  ;;  %2369 = vmatpush3.msra.mxu0 %v138_v26 }
  0x31   :  { %2407 = vmatpush3.msra.mxu1 %v170_v27  ;;  %2370 = vmatprep.subr.mxu0 %v153_v28 }
  0x32   :  { %2408 = vmatprep.subr.mxu1 %v185_v29  ;;  %2371 = vmatpush3.msra.mxu0 %v137_v30 }
  0x33   :  { %2409 = vmatpush3.msra.mxu1 %v169_v31 }
  0x34   :  { %19 = vsyncpa [#allocation4], 0  ;;  %2372 = vmatprep.subr.mxu0 %v152_v32  ;;  %2410 = vmatprep.subr.mxu1 %v184_v33  ;;  %v135_v38 = vld [vmem:[%s3667_s2 + $0x238] sm:$0xff]  ;;  %v150_v40 = vld [vmem:[%s3667_s2 + $0x2b0] sm:$0xff]  ;;  %vm510_vm0 = vcmask 523264   ;;  %vm2808_vm1 = vmmov 0  }
  0x35   :  { %v167_v39 = vld [vmem:[%s3667_s2 + $0x338] sm:$0xff]  ;;  %2373 = vmatpush3.msra.mxu0 %v136_v34  ;;  %2411 = vmatpush3.msra.mxu1 %v168_v35  ;;  %v182_v41 = vld [vmem:[%s3667_s2 + $0x3b0] sm:$0xff]  ;;  %v149_v44 = vld [vmem:[%s3667_s2 + $0x2a8] sm:$0xff]  ;;  %vm789_vm2 = vcmask 261120   ;;  %vm866_vm3 = vcmask 64512   ;;  %vm2031_vm4 = vcmask 130048  }
  0x36   :  { %2374 = vmatprep.subr.mxu0 %v151_v36  ;;  %2412 = vmatprep.subr.mxu1 %v183_v37  ;;  %v134_v42 = vld [vmem:[%s3667_s2 + $0x230] sm:$0xff]  ;;  %v181_v45 = vld [vmem:[%s3667_s2 + $0x3a8] sm:$0xff]  ;;  %v148_v48 = vld [vmem:[%s3667_s2 + $0x2a0] sm:$0xff] }
  0x37   :  { %v166_v43 = vld [vmem:[%s3667_s2 + $0x330] sm:$0xff]  ;;  %2375 = vmatpush3.msra.mxu0 %v135_v38  ;;  %2413 = vmatpush3.msra.mxu1 %v167_v39  ;;  %v133_v46 = vld [vmem:[%s3667_s2 + $0x228] sm:$0xff]  ;;  %v180_v49 = vld [vmem:[%s3667_s2 + $0x3a0] sm:$0xff] }
  0x38   :  { %2376 = vmatprep.subr.mxu0 %v150_v40  ;;  %2414 = vmatprep.subr.mxu1 %v182_v41  ;;  %v165_v47 = vld [vmem:[%s3667_s2 + $0x328] sm:$0xff]  ;;  %v132_v50 = vld [vmem:[%s3667_s2 + $0x220] sm:$0xff]  ;;  %v147_v52 = vld [vmem:[%s3667_s2 + $0x298] sm:$0xff] }
  0x39   :  { %2377 = vmatpush3.msra.mxu0 %v134_v42  ;;  %2415 = vmatpush3.msra.mxu1 %v166_v43  ;;  %v164_v51 = vld [vmem:[%s3667_s2 + $0x320] sm:$0xff]  ;;  %v179_v53 = vld [vmem:[%s3667_s2 + $0x398] sm:$0xff]  ;;  %v57_v54 = vld [vmem:[%s3665_s0 + $0x48] sm:$0xff] }
  0x3a   :  { %2378 = vmatprep.subr.mxu0 %v149_v44  ;;  %2416 = vmatprep.subr.mxu1 %v181_v45  ;;  %v131_v55 = vld [vmem:[%s3667_s2 + $0x218] sm:$0xff]  ;;  %v56_v57 = vld [vmem:[%s3665_s0 + $0x40] sm:$0xff]  ;;  %v146_v58 = vld [vmem:[%s3667_s2 + $0x290] sm:$0xff] }
  0x3b   :  { %2379 = vmatpush3.msra.mxu0 %v133_v46  ;;  %2417 = vmatpush3.msra.mxu1 %v165_v47  ;;  %v163_v56 = vld [vmem:[%s3667_s2 + $0x318] sm:$0xff]  ;;  %v178_v59 = vld [vmem:[%s3667_s2 + $0x390] sm:$0xff]  ;;  %v145_v63 = vld [vmem:[%s3667_s2 + $0x288] sm:$0xff] }
  0x3c   :  { %2380 = vmatprep.subr.mxu0 %v148_v48  ;;  %2418 = vmatprep.subr.mxu1 %v180_v49  ;;  %v59_v60 = vld [vmem:[%s3665_s0 + $0x58] sm:$0xff]  ;;  %v130_v61 = vld [vmem:[%s3667_s2 + $0x210] sm:$0xff]  ;;  %v177_v1 = vld [vmem:[%s3667_s2 + $0x388] sm:$0xff] }
  0x3d   :  { %2381 = vmatpush3.msra.mxu0 %v132_v50  ;;  %2419 = vmatpush3.msra.mxu1 %v164_v51  ;;  %v162_v62 = vld [vmem:[%s3667_s2 + $0x310] sm:$0xff]  ;;  %v129_v2 = vld [vmem:[%s3667_s2 + $0x208] sm:$0xff]  ;;  %v144_v4 = vld [vmem:[%s3667_s2 + $0x280] sm:$0xff] }
  0x3e   :  { %2382 = vmatprep.subr.mxu0 %v147_v52  ;;  %2420 = vmatprep.subr.mxu1 %v179_v53  ;;  %v58_v0 = vld [vmem:[%s3665_s0 + $0x50] sm:$0xff]  ;;  %v161_v3 = vld [vmem:[%s3667_s2 + $0x308] sm:$0xff]  ;;  %v176_v5 = vld [vmem:[%s3667_s2 + $0x380] sm:$0xff] }
  0x3f   :  { %268 = vmatprep.mubr.f32.mxu0 %v57_v54  ;;  %2383 = vmatpush3.msra.mxu0 %v131_v55  ;;  %v128_v6 = vld [vmem:[%s3667_s2 + $0x200] sm:$0xff]  ;;  %v53_v7 = vld [vmem:[%s3665_s0 + $0x28] sm:$0xff]  ;;  %v55_v9 = vld [vmem:[%s3665_s0 + $0x38] sm:$0xff] }
  0x40   :  { %2421 = vmatpush3.msra.mxu1 %v163_v56  ;;  %269 = vmatmul.mubr.f32.gmra.mxu0 %v56_v57  ;;  %v160_v8 = vld [vmem:[%s3667_s2 + $0x300] sm:$0xff]  ;;  %v54_v11 = vld [vmem:[%s3665_s0 + $0x30] sm:$0xff]  ;;  %v61_v12 = vld [vmem:[%s3665_s0 + $0x68] sm:$0xff] }
  0x41   :  { %2384 = vmatprep.subr.mxu0 %v146_v58  ;;  %2422 = vmatprep.subr.mxu1 %v178_v59  ;;  %v52_v10 = vld [vmem:[%s3665_s0 + $0x20] sm:$0xff]  ;;  %v63_v13 = vld [vmem:[%s3665_s0 + $0x78] sm:$0xff]  ;;  %v62_v15 = vld [vmem:[%s3665_s0 + $0x70] sm:$0xff] }
  0x42   :  { %343 = vmatprep.mubr.f32.mxu1 %v59_v60  ;;  %2385 = vmatpush3.msra.mxu0 %v130_v61  ;;  %v60_v14 = vld [vmem:[%s3665_s0 + $0x60] sm:$0xff]  ;;  %v520_v16 = vld [vmem:[%s3669_s4 + $0x38] sm:$0xff]  ;;  %v519_v18 = vld [vmem:[%s3669_s4 + $0x30] sm:$0xff] }
  0x43   :  { %2423 = vmatpush3.msra.mxu1 %v162_v62  ;;  %2386 = vmatprep.subr.mxu0 %v145_v63  ;;  %v616_v17 = vld [vmem:[%s3671_s6 + $0x38] sm:$0xff]  ;;  %v615_v19 = vld [vmem:[%s3671_s6 + $0x30] sm:$0xff]  ;;  %v518_v20 = vld [vmem:[%s3669_s4 + $0x28] sm:$0xff] }
  0x44   :  { %344 = vmatmul.mubr.f32.gmra.mxu1 %v58_v0  ;;  %2424 = vmatprep.subr.mxu1 %v177_v1  ;;  %v614_v21 = vld [vmem:[%s3671_s6 + $0x28] sm:$0xff]  ;;  %v517_v22 = vld [vmem:[%s3669_s4 + $0x20] sm:$0xff]  ;;  %v516_v24 = vld [vmem:[%s3669_s4 + $0x18] sm:$0xff] }
  0x45   :  { %2387 = vmatpush3.msra.mxu0 %v129_v2  ;;  %2425 = vmatpush3.msra.mxu1 %v161_v3  ;;  %v613_v23 = vld [vmem:[%s3671_s6 + $0x20] sm:$0xff]  ;;  %v612_v25 = vld [vmem:[%s3671_s6 + $0x18] sm:$0xff]  ;;  %v515_v26 = vld [vmem:[%s3669_s4 + $0x10] sm:$0xff] }
  0x46   :  { %2388 = vmatprep.subr.mxu0 %v144_v4  ;;  %2426 = vmatprep.subr.mxu1 %v176_v5  ;;  %v611_v27 = vld [vmem:[%s3671_s6 + $0x10] sm:$0xff]  ;;  %v514_v28 = vld [vmem:[%s3669_s4 + $0x8] sm:$0xff]  ;;  %v513_v30 = vld [vmem:[%s3669_s4] sm:$0xff] }
  0x47   :  { %2389 = vmatpush3.msra.mxu0 %v128_v6  ;;  %413 = vmatprep.mubr.f32.mxu0 %v53_v7  ;;  %v610_v29 = vld [vmem:[%s3671_s6 + $0x8] sm:$0xff]  ;;  %v609_v31 = vld [vmem:[%s3671_s6] sm:$0xff]  ;;  %v706_v32 = vld [vmem:[%s3673_s8 + $0x38] sm:$0xff] }
  0x48   :  { %2427 = vmatpush3.msra.mxu1 %v160_v8  ;;  %488 = vmatprep.mubr.f32.mxu1 %v55_v9  ;;  %v2208_v40 = vld [vmem:[%s3668_s3] ss:$0 sm:$0xff]  ;;  %v705_v6 = vld [vmem:[%s3673_s8 + $0x30] sm:$0xff]  ;;  %v704_v8 = vld [vmem:[%s3673_s8 + $0x28] sm:$0xff] }
  0x49   :  { %414 = vmatmul.mubr.f32.vlgmr.msra.gmra.mxu0 %v52_v10  ;;  %489 = vmatmul.mubr.f32.vlgmr.msra.gmra.mxu1 %v54_v11  ;;  %v2209_v63 = vld [vmem:[%s3676_s11] ss:$0 sm:$0xff]  ;;  %v702_v10 = vld [vmem:[%s3673_s8 + $0x18] sm:$0xff]  ;;  %v701_v11 = vld [vmem:[%s3673_s8 + $0x10] sm:$0xff] }
  0x4a   :  { %418 = vmatprep.mubr.f32.mxu0 %v61_v12  ;;  %493 = vmatprep.mubr.f32.mxu1 %v63_v13  ;;  %v703_v9 = vld [vmem:[%s3673_s8 + $0x20] sm:$0xff]  ;;  %v700_v12 = vld [vmem:[%s3673_s8 + $0x8] sm:$0xff] }
  0x4b   :  { %2542 = vmatprep.subr.mxu0 %v520_v16  ;;  %2561 = vmatprep.subr.mxu1 %v616_v17  ;;  %v699_v13 = vld [vmem:[%s3673_s8] sm:$0xff] }
  0x4c   :  { %2543 = vmatpush3.msra.mxu0 %v520_v16  ;;  %2562 = vmatpush3.msra.mxu1 %v616_v17  ;;  %v2213_v17 = vld [vmem:[%s3672_s7] ss:$0 sm:$0xff] }
  0x4d   :  { %419 = vmatmul.mubr.f32.gmra.mxu0 %v60_v14  ;;  %494 = vmatmul.mubr.f32.gmra.mxu1 %v62_v15  ;;  %v2807_v14 = vmov 0.0  }
  0x4e   :  { %2544 = vmatprep.subr.mxu0 %v519_v18  ;;  %2563 = vmatprep.subr.mxu1 %v615_v19 }
  0x4f   :  { %2545 = vmatpush3.msra.mxu0 %v519_v18  ;;  %2564 = vmatpush3.msra.mxu1 %v615_v19 }
  0x50   :  { %2546 = vmatprep.subr.mxu0 %v518_v20  ;;  %2565 = vmatprep.subr.mxu1 %v614_v21 }
  0x51   :  { %2547 = vmatpush3.msra.mxu0 %v518_v20  ;;  %2566 = vmatpush3.msra.mxu1 %v614_v21  ;;  %v2210_v21 = vld [vmem:[%s3670_s5] ss:$0 sm:$0xff] }
  0x52   :  { %2548 = vmatprep.subr.mxu0 %v517_v22  ;;  %2567 = vmatprep.subr.mxu1 %v613_v23 }
  0x53   :  { %2549 = vmatpush3.msra.mxu0 %v517_v22  ;;  %2568 = vmatpush3.msra.mxu1 %v613_v23 }
  0x54   :  { %2550 = vmatprep.subr.mxu0 %v516_v24  ;;  %2569 = vmatprep.subr.mxu1 %v612_v25 }
  0x55   :  { %2551 = vmatpush3.msra.mxu0 %v516_v24  ;;  %2570 = vmatpush3.msra.mxu1 %v612_v25  ;;  %v2216_v25 = vld [vmem:[%s3674_s9] ss:$0 sm:$0xff] }
  0x56   :  { %2552 = vmatprep.subr.mxu0 %v515_v26  ;;  %2571 = vmatprep.subr.mxu1 %v611_v27 }
  0x57   :  { %2553 = vmatpush3.msra.mxu0 %v515_v26  ;;  %2572 = vmatpush3.msra.mxu1 %v611_v27 }
  0x58   :  { %2554 = vmatprep.subr.mxu0 %v514_v28  ;;  %2573 = vmatprep.subr.mxu1 %v610_v29 }
  0x59   :  { %2555 = vmatpush3.msra.mxu0 %v514_v28  ;;  %2574 = vmatpush3.msra.mxu1 %v610_v29 }
  0x5a   :  { %2556 = vmatprep.subr.mxu0 %v513_v30  ;;  %2575 = vmatprep.subr.mxu1 %v609_v31 }
  0x5b   :  { %2557 = vmatpush3.msra.mxu0 %v513_v30  ;;  %2576 = vmatpush3.msra.mxu1 %v609_v31 }
  0x5c   :  { %2580 = vmatprep.subr.mxu0 %v706_v32  ;;  %2604 = vmatprep.subr.mxu1 %v2807_v14 }
  0xe4   :  { %v2314_v33 = vpop.f32.mrf.mxu0 }
  0xe6   :  { %v2352_v34 = vpop.f32.mrf.mxu1  ;;  %v2315_v35 = vpop.f32.mrf.mxu0 }
  0xe7   :  { %v2316_v38 = vadd.f32 %v2315_v35, %v2314_v33 }
  0xe8   :  { %v2353_v37 = vpop.f32.mrf.mxu1 }
  0xe9   :  { %v266_v43 = vadd.f32 %v2316_v38, %v2208_v40  ;;  %v2354_v44 = vadd.f32 %v2353_v37, %v2352_v34 }
  0xeb   :  { %v341_v50 = vadd.f32 %v2354_v44, %v266_v43 }
 0x100   :  { %v2317_v36 = vpop.f32.mrf.mxu0 }
 0x102   :  { %v2318_v41 = vpop.f32.mrf.mxu0 }
 0x103   :  { %v2319_v45 = vadd.f32 %v2318_v41, %v2317_v36 }
 0x104   :  { %v2355_v39 = vpop.f32.mrf.mxu1 }
 0x105   :  { %v271_v51 = vadd.f32 %v2319_v45, %v2208_v40 }
 0x106   :  { %v2356_v42 = vpop.f32.mrf.mxu1 }
 0x107   :  { %v2357_v52 = vadd.f32 %v2356_v42, %v2355_v39 }
 0x109   :  { %v2390_v46 = vpop.f32.mrf.mxu0  ;;  %v2428_v47 = vpop.f32.mrf.mxu1  ;;  %v346_v60 = vadd.f32 %v2357_v52, %v271_v51 }
 0x10b   :  { %v2391_v48 = vpop.f32.mrf.mxu0  ;;  %v2429_v49 = vpop.f32.mrf.mxu1 }
 0x10c   :  { %v2392_v53 = vadd.f32 %v2391_v48, %v2390_v46  ;;  %v2430_v57 = vadd.f32 %v2429_v49, %v2428_v47  ;;  %v955_v46 = vld [vmem:[%s3675_s10 + $0x18] sm:$0xff]  ;;  %v954_v47 = vld [vmem:[%s3675_s10 + $0x10] sm:$0xff]  ;;  %v953_v48 = vld [vmem:[%s3675_s10 + $0x8] sm:$0xff] }
 0x10d   :  { %v2393_v54 = vpop.f32.mrf.mxu0  ;;  %v2431_v55 = vpop.f32.mrf.mxu1  ;;  %v952_v49 = vld [vmem:[%s3675_s10] sm:$0xff] }
 0x10e   :  { %v416_v56 = vadd.f32 %v2392_v53, %v341_v50 }
 0x10f   :  { %v2394_v58 = vpop.f32.mrf.mxu0  ;;  %v2432_v59 = vpop.f32.mrf.mxu1 }
 0x110   :  { %v491_v61 = vadd.f32 %v2430_v57, %v416_v56  ;;  %v2395_v62 = vadd.f32 %v2394_v58, %v2393_v54  ;;  %v2433_v2 = vadd.f32 %v2432_v59, %v2431_v55  ;;  %v2234_v56 = vld [vmem:[%s3669_s4 + $0x78] sm:$0xff]  ;;  %v2233_v59 = vld [vmem:[%s3669_s4 + $0x70] sm:$0xff] }
 0x112   :  { %v3374_v0 = vmax.f32 %v491_v61, 0.0  ;;  %v421_v1 = vadd.f32 %v2395_v62, %v346_v60  ;;  %v2232_v60 = vld [vmem:[%s3669_s4 + $0x68] sm:$0xff]  ;;  %v2231_v61 = vld [vmem:[%s3669_s4 + $0x60] sm:$0xff]  ;;  %v2230_v62 = vld [vmem:[%s3669_s4 + $0x58] sm:$0xff] }
 0x114   :  { %v496_v3 = vadd.f32 %v2433_v2, %v421_v1  ;;  %2558 = vmatprep.mubr.msk.f32.mxu0 %vm510_vm0, %v3374_v0  ;;  %2577 = vmatprep.mubr.msk.f32.mxu1 %vm510_vm0, %v3374_v0  ;;  %v508_v4 = vadd.f32 %v2209_v63, %v3374_v0  ;;  %v2228_v1 = vld [vmem:[%s3669_s4 + $0x48] sm:$0xff]  ;;  %v2227_v2 = vld [vmem:[%s3669_s4 + $0x40] sm:$0xff] }
 0x116   :  { %v3381_v5 = vmax.f32 %v496_v3, 0.0  ;;  %511 = vst.msk [vmem:[#allocation2] sm:$0xff] %vm510_vm0, %v508_v4  ;;  %v2258_v3 = vld [vmem:[%s3673_s8 + $0x78] sm:$0xff]  ;;  %v2257_v4 = vld [vmem:[%s3673_s8 + $0x70] sm:$0xff] }
 0x118   :  { %2559 = vmatmul.mubr.msk.f32.vlgmr.msra.gmra.mxu0 %vm510_vm0, %v3381_v5  ;;  %2578 = vmatmul.mubr.msk.f32.vlgmr.msra.gmra.mxu1 %vm510_vm0, %v3381_v5  ;;  %v509_v7 = vadd.f32 %v2209_v63, %v3381_v5  ;;  %v2229_v63 = vld [vmem:[%s3669_s4 + $0x50] sm:$0xff] }
 0x119   :  { %2581 = vmatpush3.msra.mxu0 %v706_v32  ;;  %2596 = vmatprep.mubr.msk.f32.mxu0 %vm510_vm0, %v3374_v0 }
 0x11a   :  { %2582 = vmatprep.subr.mxu0 %v705_v6  ;;  %512 = vst.msk [vmem:[#allocation2 + $0x8] sm:$0xff] %vm510_vm0, %v509_v7  ;;  %2606 = vmatprep.mubr.msk.f32.mxu1 %vm2808_vm1, %v2807_v14  ;;  %v2255_v7 = vld [vmem:[%s3673_s8 + $0x60] sm:$0xff] }
 0x11b   :  { %2583 = vmatpush3.msra.mxu0 %v705_v6  ;;  %v2256_v6 = vld [vmem:[%s3673_s8 + $0x68] sm:$0xff] }
 0x11c   :  { %2584 = vmatprep.subr.mxu0 %v704_v8 }
 0x11d   :  { %2585 = vmatpush3.msra.mxu0 %v704_v8  ;;  %v2254_v8 = vld [vmem:[%s3673_s8 + $0x58] sm:$0xff] }
 0x11e   :  { %2586 = vmatprep.subr.mxu0 %v703_v9 }
 0x11f   :  { %2587 = vmatpush3.msra.mxu0 %v703_v9  ;;  %v2253_v9 = vld [vmem:[%s3673_s8 + $0x50] sm:$0xff] }
 0x120   :  { %2588 = vmatprep.subr.mxu0 %v702_v10 }
 0x121   :  { %2589 = vmatpush3.msra.mxu0 %v702_v10  ;;  %v2252_v10 = vld [vmem:[%s3673_s8 + $0x48] sm:$0xff] }
 0x122   :  { %2590 = vmatprep.subr.mxu0 %v701_v11 }
 0x123   :  { %2591 = vmatpush3.msra.mxu0 %v701_v11  ;;  %v2251_v11 = vld [vmem:[%s3673_s8 + $0x40] sm:$0xff] }
 0x124   :  { %2592 = vmatprep.subr.mxu0 %v700_v12 }
 0x125   :  { %2593 = vmatpush3.msra.mxu0 %v700_v12  ;;  %v2246_v12 = vld [vmem:[%s3671_s6 + $0x78] sm:$0xff] }
 0x126   :  { %2594 = vmatprep.subr.mxu0 %v699_v13 }
 0x127   :  { %2595 = vmatpush3.msra.mxu0 %v699_v13  ;;  %v951_v13 = vld [vmem:[#allocation2] sm:$0xff] }
 0x128   :  { %2597 = vmatmul.mubr.msk.f32.vlgmr.msra.gmra.mxu0 %vm510_vm0, %v3381_v5  ;;  %2599 = vmatprep.subr.mxu0 %v2807_v14 }
 0x129   :  { %2601 = vmatprep.mubr.msk.f32.mxu0 %vm2808_vm1, %v2807_v14 }
 0x1d8   :  { %v2560_v15 = vpop.f32.mrf.mxu0  ;;  %v2579_v16 = vpop.f32.mrf.mxu1 }
 0x1d9   :  { %v696_v23 = vadd.f32 %v2579_v16, %v2213_v17  ;;  %v606_v24 = vadd.f32 %v2560_v15, %v2210_v21 }
 0x1da   :  { %v690_v18 = vpop.f32.mrf.mxu1  ;;  %v600_v19 = vpop.f32.mrf.mxu0 }
 0x1db   :  { %v691_v20 = vadd.f32 %v2213_v17, %v690_v18  ;;  %v601_v22 = vadd.f32 %v2210_v21, %v600_v19  ;;  %v2245_v19 = vld [vmem:[%s3671_s6 + $0x70] sm:$0xff]  ;;  %v2244_v21 = vld [vmem:[%s3671_s6 + $0x68] sm:$0xff] }
 0x1dd   :  { %2600 = vmatpush3.xpose.msk.msra.mxu0 %vm789_vm2, %v691_v20 }
 0x1de   :  { %2620 = vmatprep.subr.mxu0 %v2807_v14 }
 0x1e0   :  { %2602 = vmatmul.mubr.msk.f32.vlgmr.msra.gmra.mxu0 %vm789_vm2, %v601_v22  ;;  %v2243_v22 = vld [vmem:[%s3671_s6 + $0x60] sm:$0xff] }
 0x1e1   :  { %2621 = vmatpush3.xpose.msk.msra.mxu0 %vm789_vm2, %v696_v23  ;;  %2622 = vmatprep.mubr.msk.f32.mxu0 %vm2808_vm1, %v2807_v14  ;;  %v2242_v23 = vld [vmem:[%s3671_s6 + $0x58] sm:$0xff] }
 0x1e2   :  { %2630 = vmatprep.subr.mxu0 %v2807_v14 }
 0x1e4   :  { %2623 = vmatmul.mubr.msk.f32.vlgmr.msra.gmra.mxu0 %vm789_vm2, %v606_v24  ;;  %v2240_v24 = vld [vmem:[%s3671_s6 + $0x48] sm:$0xff] }
 0x1e5   :  { %2638 = vmatprep.mubr.msk.f32.mxu0 %vm2808_vm1, %v2807_v14  ;;  %2631 = vmatpush3.msra.mxu0 %v955_v46 }
 0x1e6   :  { %2632 = vmatprep.subr.mxu0 %v2807_v14 }
 0x1e7   :  { %2633 = vmatpush3.msra.mxu0 %v954_v47 }
 0x1e8   :  { %v2598_v26 = vpop.f32.mrf.mxu0  ;;  %2634 = vmatprep.subr.mxu0 %v2807_v14 }
 0x1e9   :  { %v786_v27 = vadd.f32 %v2598_v26, %v2216_v25  ;;  %2635 = vmatpush3.msra.mxu0 %v953_v48  ;;  %v1191_v26 = vld [vmem:[#allocation2 + $0x8] sm:$0xff] }
 0x1ea   :  { %v780_v28 = vpop.f32.mrf.mxu0  ;;  %2636 = vmatprep.subr.mxu0 %v2807_v14 }
 0x1eb   :  { %v781_v29 = vadd.f32 %v2216_v25, %v780_v28  ;;  %2637 = vmatpush3.msra.mxu0 %v952_v49  ;;  %v2239_v25 = vld [vmem:[%s3671_s6 + $0x40] sm:$0xff] }
 0x1ec   :  { %2660 = vmatprep.subr.mxu0 %v2246_v12 }
 0x1ed   :  { %2605 = vmatpush3.msra.mxu1 %v781_v29 }
 0x1ee   :  { %2609 = vmatprep.subr.mxu1 %v2807_v14 }
 0x2a0   :  { %v862_v30 = vpop.f32.mrf.mxu0 }
 0x2a1   :  { %v867_v31 = vsel %vm866_vm3, %v862_v30, -inf }
 0x2a2   :  { %868 = vmax.xlane.f32.xlu0 %v867_v31  ;;  %v2603_v32 = vpop.f32.mrf.mxu0 }
 0x2a3   :  { %v2248_v32 = vld [vmem:[%s3672_s7 + $0x1] ss:$0 sm:$0xff] }
 0x2a4   :  { %v1103_v33 = vpop.f32.mrf.mxu0 }
 0x2a5   :  { %v1107_v34 = vsel %vm866_vm3, %v1103_v33, -inf }
 0x2a6   :  { %1108 = vmax.xlane.f32.xlu1 %v1107_v34  ;;  %v2624_v35 = vpop.f32.mrf.mxu0 }
 0x32b   :  { %v869_v36 = vpop.xlane.xlu0 %868 }
 0x32c   :  { %v870_v37 = vsub.f32 %v862_v30, %v869_v36  ;;  %v2260_v36 = vld [vmem:[%s3674_s9 + $0x1] ss:$0 sm:$0xff] }
 0x32e   :  { %v871_v38 = vmul.f32 1.442695, %v870_v37 }
 0x32f   :  { %v1109_v39 = vpop.xlane.xlu1 %1108 }
 0x330   :  { %2769 = vpow2.f32 %v871_v38  ;;  %v1110_v40 = vsub.f32 %v1103_v33, %v1109_v39 }
 0x332   :  { %v1111_v41 = vmul.f32 1.442695, %v1110_v40 }
 0x334   :  { %2771 = vpow2.f32 %v1111_v41 }
 0x33d   :  { %v2770_v42 = vpop.eup %2769 }
 0x33e   :  { %v873_v43 = vsel %vm866_vm3, %v2770_v42, 0.0 }
 0x33f   :  { %874 = vadd.xlane.f32.xlu0 %v873_v43 }
 0x341   :  { %v2772_v44 = vpop.eup %2771 }
 0x342   :  { %v1113_v45 = vsel %vm866_vm3, %v2772_v44, 0.0 }
 0x343   :  { %1114 = vadd.xlane.f32.xlu1 %v1113_v45 }
 0x3c8   :  { %v875_v50 = vpop.xlane.xlu0 %874 }
 0x3c9   :  { %2773 = vrcp.f32 %v875_v50 }
 0x3cc   :  { %v1115_v53 = vpop.xlane.xlu1 %1114 }
 0x3cd   :  { %2775 = vrcp.f32 %v1115_v53 }
 0x3d6   :  { %v2774_v51 = vpop.eup %2773 }
 0x3d7   :  { %v877_v52 = vmul.f32 %v2774_v51, %v2770_v42 }
 0x3d9   :  { %2607 = vmatmul.mubr.msk.f32.vlgmr.msra.gmra.mxu1 %vm866_vm3, %v877_v52 }
 0x3da   :  { %2610 = vmatpush3.msra.mxu1 %v955_v46  ;;  %2617 = vmatprep.mubr.msk.f32.mxu1 %vm2808_vm1, %v2807_v14  ;;  %v2776_v54 = vpop.eup %2775 }
 0x3db   :  { %2611 = vmatprep.subr.mxu1 %v2807_v14  ;;  %v1117_v58 = vmul.f32 %v2776_v54, %v2772_v44 }
 0x3dc   :  { %2612 = vmatpush3.msra.mxu1 %v954_v47 }
 0x3dd   :  { %2613 = vmatprep.subr.mxu1 %v2807_v14 }
 0x3de   :  { %2614 = vmatpush3.msra.mxu1 %v953_v48 }
 0x3df   :  { %2615 = vmatprep.subr.mxu1 %v2807_v14 }
 0x3e0   :  { %2616 = vmatpush3.msra.mxu1 %v952_v49 }
 0x3e1   :  { %2625 = vmatprep.subr.mxu1 %v2807_v14 }
 0x499   :  { %v947_v55 = vpop.f32.mrf.mxu1 }
 0x49a   :  { %2618 = vmatmul.mubr.msk.f32.vlgmr.msra.gmra.mxu1 %vm789_vm2, %v947_v55 }
 0x49b   :  { %2626 = vmatpush3.msra.mxu1 %v786_v27  ;;  %v2608_v57 = vpop.f32.mrf.mxu1  ;;  %2627 = vmatprep.mubr.msk.f32.mxu1 %vm2808_vm1, %v2807_v14 }
 0x49c   :  { %2641 = vmatprep.subr.mxu1 %v2234_v56 }
 0x49e   :  { %2628 = vmatmul.mubr.msk.f32.vlgmr.msra.gmra.mxu1 %vm866_vm3, %v1117_v58 }
 0x49f   :  { %2642 = vmatpush3.msra.mxu1 %v2234_v56  ;;  %2657 = vmatprep.mubr.msk.f32.mxu1 %vm510_vm0, %v3374_v0 }
 0x4a0   :  { %2643 = vmatprep.subr.mxu1 %v2233_v59 }
 0x4a1   :  { %2644 = vmatpush3.msra.mxu1 %v2233_v59 }
 0x4a2   :  { %2645 = vmatprep.subr.mxu1 %v2232_v60 }
 0x4a3   :  { %2646 = vmatpush3.msra.mxu1 %v2232_v60 }
 0x4a4   :  { %2647 = vmatprep.subr.mxu1 %v2231_v61 }
 0x4a5   :  { %2648 = vmatpush3.msra.mxu1 %v2231_v61 }
 0x4a6   :  { %2649 = vmatprep.subr.mxu1 %v2230_v62 }
 0x4a7   :  { %2650 = vmatpush3.msra.mxu1 %v2230_v62 }
 0x4a8   :  { %2651 = vmatprep.subr.mxu1 %v2229_v63 }
 0x4a9   :  { %2652 = vmatpush3.msra.mxu1 %v2229_v63 }
 0x4aa   :  { %2653 = vmatprep.subr.mxu1 %v2228_v1 }
 0x4ab   :  { %2654 = vmatpush3.msra.mxu1 %v2228_v1 }
 0x4ac   :  { %2655 = vmatprep.subr.mxu1 %v2227_v2 }
 0x4ad   :  { %2656 = vmatpush3.msra.mxu1 %v2227_v2 }
 0x4ae   :  { %2658 = vmatmul.mubr.msk.f32.vlgmr.msra.gmra.mxu1 %vm510_vm0, %v3381_v5  ;;  %2679 = vmatprep.subr.mxu1 %v2258_v3 }
 0x4af   :  { %2680 = vmatpush3.msra.mxu1 %v2258_v3  ;;  %2695 = vmatprep.mubr.msk.f32.mxu1 %vm510_vm0, %v3374_v0  ;;  %v2269_v3 = vld [vmem:[%s3675_s10 + $0x38] sm:$0xff] }
 0x4b0   :  { %2681 = vmatprep.subr.mxu1 %v2257_v4 }
 0x4b1   :  { %2682 = vmatpush3.msra.mxu1 %v2257_v4  ;;  %v2268_v4 = vld [vmem:[%s3675_s10 + $0x30] sm:$0xff] }
 0x4b2   :  { %2683 = vmatprep.subr.mxu1 %v2256_v6 }
 0x4b3   :  { %2684 = vmatpush3.msra.mxu1 %v2256_v6  ;;  %v2267_v6 = vld [vmem:[%s3675_s10 + $0x28] sm:$0xff] }
 0x4b4   :  { %2685 = vmatprep.subr.mxu1 %v2255_v7 }
 0x4b5   :  { %2686 = vmatpush3.msra.mxu1 %v2255_v7  ;;  %v2266_v7 = vld [vmem:[%s3675_s10 + $0x20] sm:$0xff] }
 0x4b6   :  { %2687 = vmatprep.subr.mxu1 %v2254_v8 }
 0x4b7   :  { %2688 = vmatpush3.msra.mxu1 %v2254_v8 }
 0x4b8   :  { %2689 = vmatprep.subr.mxu1 %v2253_v9 }
 0x4b9   :  { %2690 = vmatpush3.msra.mxu1 %v2253_v9 }
 0x4ba   :  { %2691 = vmatprep.subr.mxu1 %v2252_v10 }
 0x4bb   :  { %2692 = vmatpush3.msra.mxu1 %v2252_v10 }
 0x4bc   :  { %2693 = vmatprep.subr.mxu1 %v2251_v11 }
 0x4bd   :  { %2694 = vmatpush3.msra.mxu1 %v2251_v11 }
 0x4be   :  { %2696 = vmatmul.mubr.msk.f32.vlgmr.msra.gmra.mxu1 %vm510_vm0, %v3381_v5  ;;  %2719 = vmatprep.subr.mxu1 %v2807_v14 }
 0x4bf   :  { %2721 = vmatprep.mubr.msk.f32.mxu1 %vm2808_vm1, %v2807_v14 }
 0x55a   :  { %v1025_v15 = vpop.f32.mrf.mxu1 }
 0x55b   :  { %v1029_v16 = vadd.f32 %v1025_v15, %v951_v13 }
 0x55c   :  { %v2619_v17 = vpop.f32.mrf.mxu1 }
 0x55d   :  { %1030 = vst.msk [vmem:[#allocation2] sm:$0xff] %vm510_vm0, %v1029_v16 }
 0x55e   :  { %v1187_v18 = vpop.f32.mrf.mxu1 }
 0x55f   :  { %2639 = vmatmul.mubr.msk.f32.vlgmr.msra.gmra.mxu0 %vm789_vm2, %v1187_v18 }
 0x560   :  { %2661 = vmatpush3.msra.mxu0 %v2246_v12  ;;  %v2629_v20 = vpop.f32.mrf.mxu1  ;;  %2676 = vmatprep.mubr.msk.f32.mxu0 %vm510_vm0, %v3374_v0  ;;  %v2241_v0 = vld [vmem:[%s3671_s6 + $0x50] sm:$0xff] }
 0x561   :  { %2662 = vmatprep.subr.mxu0 %v2245_v19 }
 0x562   :  { %2663 = vmatpush3.msra.mxu0 %v2245_v19 }
 0x563   :  { %2664 = vmatprep.subr.mxu0 %v2244_v21 }
 0x564   :  { %2665 = vmatpush3.msra.mxu0 %v2244_v21  ;;  %v1707_v12 = vld [vmem:[#allocation2] sm:$0xff] }
 0x565   :  { %2666 = vmatprep.subr.mxu0 %v2243_v22 }
 0x566   :  { %2667 = vmatpush3.msra.mxu0 %v2243_v22  ;;  %v2028_v22 = vld [vmem:[%s3666_s1] sm:$0x3] }
 0x567   :  { %2668 = vmatprep.subr.mxu0 %v2242_v23 }
 0x568   :  { %2669 = vmatpush3.msra.mxu0 %v2242_v23 }
 0x569   :  { %2670 = vmatprep.subr.mxu0 %v2241_v0 }
 0x56a   :  { %2671 = vmatpush3.msra.mxu0 %v2241_v0  ;;  %v2112_v0 = vld [vmem:[%s3677_s12 + $0x38] sm:$0xff] }
 0x56b   :  { %2672 = vmatprep.subr.mxu0 %v2240_v24 }
 0x56c   :  { %2673 = vmatpush3.msra.mxu0 %v2240_v24  ;;  %v2111_v24 = vld [vmem:[%s3677_s12 + $0x30] sm:$0xff] }
 0x56d   :  { %2674 = vmatprep.subr.mxu0 %v2239_v25 }
 0x56e   :  { %2675 = vmatpush3.msra.mxu0 %v2239_v25  ;;  %v2659_v30 = vpop.f32.mrf.mxu1  ;;  %v2110_v25 = vld [vmem:[%s3677_s12 + $0x28] sm:$0xff] }
 0x56f   :  { %2677 = vmatmul.mubr.msk.f32.vlgmr.msra.gmra.mxu0 %vm510_vm0, %v3381_v5  ;;  %2698 = vmatprep.subr.mxu0 %v2807_v14  ;;  %v2236_v5 = vld [vmem:[%s3670_s5 + $0x1] ss:$0 sm:$0xff]  ;;  %s2809_s5 = smov [#allocation3]  }
 0x570   :  { %2700 = vmatprep.mubr.msk.f32.mxu0 %vm2808_vm1, %v2807_v14  ;;  %v1354_v31 = vpop.f32.mrf.mxu1  ;;  %v1360_v39 = vadd.f32 %v2659_v30, %v2236_v5  ;;  %v2105_v30 = vld [vmem:[%s3677_s12] sm:$0xff]  ;;  %s2200_s7 = sshll.u32 %s2809_s5, 4  ;;  %s2201_s7 = int_to_ptr.vmem [resolvable:$true] %s2200_s7 }
 0x571   :  { %v1355_v42 = vadd.f32 %v2236_v5, %v1354_v31  ;;  %s2785_s9 = scalar_lea.vmem %s2201_s7, 32  ;;  %p2790_p1 = scmp.lt.s32.totalorder %s2201_s7, %s2201_s7 }
 0x572   :  { %p2786_p0 = scmp.ne.s32.totalorder %s2201_s7, %s2785_s9  ;;  %p2791_p2 = scmp.lt.s32.totalorder %s2785_s9, %s2785_s9 }
 0x574   :  { %p2792_p3 = por %p2791_p2, %p2790_p1 }
 0x576   :  { %p2793_p4 = pnand %p2792_p3, %p2786_p0 }
 0x57e   :  { %v2697_v33 = vpop.f32.mrf.mxu1 }
 0x57f   :  { %v1544_v41 = vadd.f32 %v2697_v33, %v2260_v36  ;;  %v2280_v33 = vld [vmem:[%s3678_s13] ss:$0 sm:$0xff] }
 0x580   :  { %v1538_v40 = vpop.f32.mrf.mxu1 }
 0x581   :  { %v1539_v43 = vadd.f32 %v2260_v36, %v1538_v40 }
 0x61f   :  { %v1265_v27 = vpop.f32.mrf.mxu0 }
 0x620   :  { %v1269_v28 = vadd.f32 %v1265_v27, %v1191_v26  ;;  %v2109_v26 = vld [vmem:[%s3677_s12 + $0x20] sm:$0xff]  ;;  %v2108_v27 = vld [vmem:[%s3677_s12 + $0x18] sm:$0xff] }
 0x621   :  { %v2640_v29 = vpop.f32.mrf.mxu0 }
 0x622   :  { %1270 = vst.msk [vmem:[#allocation2 + $0x8] sm:$0xff] %vm510_vm0, %v1269_v28  ;;  %v2107_v28 = vld [vmem:[%s3677_s12 + $0x10] sm:$0xff]  ;;  %v2106_v29 = vld [vmem:[%s3677_s12 + $0x8] sm:$0xff] }
 0x629   :  { %v1948_v17 = vld [vmem:[#allocation2 + $0x8] sm:$0xff] }
 0x62f   :  { %v2678_v34 = vpop.f32.mrf.mxu0 }
 0x630   :  { %v1452_v35 = vadd.f32 %v2678_v34, %v2248_v32 }
 0x631   :  { %v1446_v37 = vpop.f32.mrf.mxu0 }
 0x632   :  { %v1447_v38 = vadd.f32 %v2248_v32, %v1446_v37  ;;  %2720 = vmatpush3.xpose.msk.msra.mxu1 %vm789_vm2, %v1452_v35 }
 0x633   :  { %2724 = vmatprep.subr.mxu1 %v2807_v14 }
 0x634   :  { %2699 = vmatpush3.xpose.msk.msra.mxu0 %vm789_vm2, %v1447_v38 }
 0x635   :  { %2722 = vmatmul.mubr.msk.f32.vlgmr.msra.gmra.mxu1 %vm789_vm2, %v1360_v39  ;;  %2703 = vmatprep.subr.mxu0 %v2807_v14 }
 0x636   :  { %2725 = vmatpush3.msra.mxu1 %v1544_v41  ;;  %2726 = vmatprep.mubr.msk.f32.mxu1 %vm2808_vm1, %v2807_v14 }
 0x637   :  { %2701 = vmatmul.mubr.msk.f32.vlgmr.msra.gmra.mxu0 %vm789_vm2, %v1355_v42  ;;  %2740 = vmatprep.subr.mxu1 %v2807_v14 }
 0x638   :  { %2704 = vmatpush3.msra.mxu0 %v1539_v43  ;;  %2705 = vmatprep.mubr.msk.f32.mxu0 %vm2808_vm1, %v2807_v14 }
 0x639   :  { %2708 = vmatprep.subr.mxu0 %v2807_v14 }
 0x6f5   :  { %v1860_v44 = vpop.f32.mrf.mxu1 }
 0x6f6   :  { %v1864_v45 = vsel %vm866_vm3, %v1860_v44, -inf }
 0x6f7   :  { %1865 = vmax.xlane.f32.xlu1 %v1864_v45  ;;  %v1619_v46 = vpop.f32.mrf.mxu0  ;;  %v2723_v47 = vpop.f32.mrf.mxu1 }
 0x6f8   :  { %v1623_v48 = vsel %vm866_vm3, %v1619_v46, -inf }
 0x6f9   :  { %1624 = vmax.xlane.f32.xlu0 %v1623_v48  ;;  %v2702_v49 = vpop.f32.mrf.mxu0 }
 0x780   :  { %v1866_v50 = vpop.xlane.xlu1 %1865 }
 0x781   :  { %v1867_v51 = vsub.f32 %v1860_v44, %v1866_v50 }
 0x782   :  { %v1625_v52 = vpop.xlane.xlu0 %1624 }
 0x783   :  { %v1868_v53 = vmul.f32 1.442695, %v1867_v51  ;;  %v1626_v54 = vsub.f32 %v1619_v46, %v1625_v52 }
 0x785   :  { %2777 = vpow2.f32 %v1868_v53  ;;  %v1627_v55 = vmul.f32 1.442695, %v1626_v54 }
 0x787   :  { %2779 = vpow2.f32 %v1627_v55 }
 0x792   :  { %v2778_v56 = vpop.eup %2777 }
 0x793   :  { %v1870_v57 = vsel %vm866_vm3, %v2778_v56, 0.0 }
 0x794   :  { %v2780_v58 = vpop.eup %2779  ;;  %1871 = vadd.xlane.f32.xlu1 %v1870_v57 }
 0x795   :  { %v1629_v59 = vsel %vm866_vm3, %v2780_v58, 0.0 }
 0x796   :  { %1630 = vadd.xlane.f32.xlu0 %v1629_v59 }
 0x81d   :  { %v1872_v60 = vpop.xlane.xlu1 %1871 }
 0x81e   :  { %2781 = vrcp.f32 %v1872_v60 }
 0x81f   :  { %v1631_v61 = vpop.xlane.xlu0 %1630 }
 0x820   :  { %2783 = vrcp.f32 %v1631_v61 }
 0x82b   :  { %v2782_v62 = vpop.eup %2781 }
 0x82c   :  { %v1874_v63 = vmul.f32 %v2782_v62, %v2778_v56 }
 0x82d   :  { %v2784_v1 = vpop.eup %2783 }
 0x82e   :  { %2727 = vmatmul.mubr.msk.f32.vlgmr.msra.gmra.mxu1 %vm866_vm3, %v1874_v63  ;;  %v1633_v2 = vmul.f32 %v2784_v1, %v2780_v58 }
 0x82f   :  { %2744 = vmatprep.mubr.msk.f32.mxu1 %vm2808_vm1, %v2807_v14 }
 0x830   :  { %2706 = vmatmul.mubr.msk.f32.vlgmr.msra.gmra.mxu0 %vm866_vm3, %v1633_v2 }
 0x831   :  { %2709 = vmatpush3.msra.mxu0 %v2269_v3  ;;  %2716 = vmatprep.mubr.msk.f32.mxu0 %vm2808_vm1, %v2807_v14 }
 0x832   :  { %2710 = vmatprep.subr.mxu0 %v2807_v14 }
 0x833   :  { %2711 = vmatpush3.msra.mxu0 %v2268_v4 }
 0x834   :  { %2712 = vmatprep.subr.mxu0 %v2807_v14 }
 0x835   :  { %2713 = vmatpush3.msra.mxu0 %v2267_v6 }
 0x836   :  { %2714 = vmatprep.subr.mxu0 %v2807_v14 }
 0x837   :  { %2715 = vmatpush3.msra.mxu0 %v2266_v7 }
 0x838   :  { %2729 = vmatprep.subr.mxu0 %v2807_v14 }
 0x8ee   :  { %v1944_v8 = vpop.f32.mrf.mxu1 }
 0x8f0   :  { %v1703_v9 = vpop.f32.mrf.mxu0  ;;  %v2728_v10 = vpop.f32.mrf.mxu1 }
 0x8f1   :  { %2717 = vmatmul.mubr.msk.f32.vlgmr.msra.gmra.mxu0 %vm789_vm2, %v1703_v9 }
 0x8f2   :  { %2730 = vmatpush3.msra.mxu0 %v2269_v3  ;;  %v2707_v11 = vpop.f32.mrf.mxu0  ;;  %2737 = vmatprep.mubr.msk.f32.mxu0 %vm2808_vm1, %v2807_v14 }
 0x8f3   :  { %2731 = vmatprep.subr.mxu0 %v2807_v14 }
 0x8f4   :  { %2732 = vmatpush3.msra.mxu0 %v2268_v4 }
 0x8f5   :  { %2733 = vmatprep.subr.mxu0 %v2807_v14 }
 0x8f6   :  { %2734 = vmatpush3.msra.mxu0 %v2267_v6 }
 0x8f7   :  { %2735 = vmatprep.subr.mxu0 %v2807_v14 }
 0x8f8   :  { %2736 = vmatpush3.msra.mxu0 %v2266_v7 }
 0x8f9   :  { %2738 = vmatmul.mubr.msk.f32.vlgmr.msra.gmra.mxu0 %vm789_vm2, %v1944_v8 }
 0x9b1   :  { %v1782_v13 = vpop.f32.mrf.mxu0 }
 0x9b2   :  { %v1786_v15 = vadd.f32 %v1782_v13, %v1707_v12 }
 0x9b3   :  { %v2718_v16 = vpop.f32.mrf.mxu0 }
 0x9b4   :  { %1787 = vst.msk [vmem:[#allocation2] sm:$0xff] %vm510_vm0, %v1786_v15 }
 0x9b9   :  { %v2022_v18 = vpop.f32.mrf.mxu0 }
 0x9ba   :  { %v2026_v19 = vadd.f32 %v2022_v18, %v1948_v17 }
 0x9bb   :  { %v2739_v20 = vpop.f32.mrf.mxu0  ;;  %v2029_v23 = vld [vmem:[#allocation2] sm:$0xff] }
 0x9bc   :  { %2027 = vst.msk [vmem:[#allocation2 + $0x8] sm:$0xff] %vm510_vm0, %v2026_v19 }
 0x9c3   :  { %v2030_v21 = vld [vmem:[#allocation2 + $0x8] sm:$0xff] }
 0x9c4   :  { %2741 = vmatpush3.msra.mxu1 %v2030_v21 }
 0x9c5   :  { %2742 = vmatprep.subr.mxu1 %v2807_v14 }
 0x9c6   :  { %2743 = vmatpush3.msra.mxu1 %v2029_v23 }
 0x9c7   :  { %2745 = vmatmul.mubr.msk.f32.vlgmr.msra.gmra.mxu1 %vm2031_vm4, %v2028_v22  ;;  %2747 = vmatprep.subr.mxu1 %v2807_v14 }
 0x9c8   :  { %2748 = vmatpush3.msra.mxu1 %v2112_v0  ;;  %2763 = vmatprep.mubr.msk.f32.mxu1 %vm2808_vm1, %v2807_v14 }
 0x9c9   :  { %2749 = vmatprep.subr.mxu1 %v2807_v14 }
 0x9ca   :  { %2750 = vmatpush3.msra.mxu1 %v2111_v24 }
 0x9cb   :  { %2751 = vmatprep.subr.mxu1 %v2807_v14 }
 0x9cc   :  { %2752 = vmatpush3.msra.mxu1 %v2110_v25 }
 0x9cd   :  { %2753 = vmatprep.subr.mxu1 %v2807_v14 }
 0x9ce   :  { %2754 = vmatpush3.msra.mxu1 %v2109_v26 }
 0x9cf   :  { %2755 = vmatprep.subr.mxu1 %v2807_v14 }
 0x9d0   :  { %2756 = vmatpush3.msra.mxu1 %v2108_v27 }
 0x9d1   :  { %2757 = vmatprep.subr.mxu1 %v2807_v14 }
 0x9d2   :  { %2758 = vmatpush3.msra.mxu1 %v2107_v28 }
 0x9d3   :  { %2759 = vmatprep.subr.mxu1 %v2807_v14 }
 0x9d4   :  { %2760 = vmatpush3.msra.mxu1 %v2106_v29 }
 0x9d5   :  { %2761 = vmatprep.subr.mxu1 %v2807_v14 }
 0x9d6   :  { %2762 = vmatpush3.msra.mxu1 %v2105_v30 }
 0xa87   :  { %v2101_v31 = vpop.f32.mrf.mxu1 }
 0xa88   :  { %2764 = vmatmul.mubr.msk.f32.vlgmr.msra.gmra.mxu1 %vm510_vm0, %v2101_v31 }
 0xa89   :  { %v2746_v32 = vpop.f32.mrf.mxu1 }
 0xb48   :  { %v2189_v34 = vpop.f32.mrf.mxu1 }
 0xb49   :  { %v2190_v5 = vadd.f32 %v2280_v33, %v2189_v34 }
 0xb4a   :  { %v2765_v35 = vpop.f32.mrf.mxu1 }
 0xb4b   :  { %2193 = vst [vmem:[#allocation3] sm:$0x3] %v2190_v5 }
 0xb4c   :  { %2796 = shalt.err (!%p2793_p4)
}
 0xb4d   :  { %2203 = dma.vmem_to_hbm [thread:$0]  %s2201_s7, 32, %s3679_s14, [#allocation4]  }
 0xb4e   :  { %2805 = dma.done.wait [#allocation4], 32  }
 0xb4f   :  { %2806 = vsyncadd [#allocation4], 4294967264 }
 0xb50   :  { %2207 = vsyncpa [#allocation4], 1 }

</bundles_post_ra>
